<compile_context>
chip_gen: v7x
topology: tpu7x:2x2x1
jax: 0.10.0
libtpu: 0.0.40
codegen_flags: <defaults>
</compile_context>

<pallas_src>
import math
from types import SimpleNamespace

import numpy as np
import jax
import jax.numpy as jnp
from jax import lax
from jax.experimental import pallas as pl
from jax.experimental.pallas import tpu as pltpu  # noqa: F401  (TPU backend)

# ----- model config (small, consistent with the module's __init__) -----
HIDDEN = 32          # config.hidden_size
VOCAB = 64           # config.symbol_vocabulary_size
N_LAYERS = 2         # config.symbolic_integration_layers
N_HEADS = 8
HEAD_DIM = HIDDEN // N_HEADS
FFN = HIDDEN * 4
LN_EPS = 1e-5
LANES = 128


# ----------------------- in-kernel math helpers -----------------------
def _gelu_exact(x):
    # PyTorch nn.GELU() / activation='gelu': exact erf formulation.
    return 0.5 * x * (1.0 + lax.erf(x * (1.0 / math.sqrt(2.0))))


def _softmax_last(x):
    m = jnp.max(x, axis=-1, keepdims=True)
    e = jnp.exp(x - m)
    return e / jnp.sum(e, axis=-1, keepdims=True)


def _layer_norm(x, g, b):
    mu = jnp.mean(x, axis=-1, keepdims=True)
    var = jnp.mean((x - mu) ** 2, axis=-1, keepdims=True)
    return (x - mu) * lax.rsqrt(var + LN_EPS) * g + b


# --------------------------- slab layout --------------------------------
def _slab_layout(B, S):
    """Static row offsets for the packed weight (bf16) and bias (f32) slabs."""
    N = B * S
    R = B * N_HEADS * S                       # rows of the head-replicated K/V
    rows_per_layer = 5 * HIDDEN + FFN         # wq,wk,wv,wo,w1 (32 rows each) + w2 (128)
    layers0 = VOCAB + 3 * HIDDEN              # emb, wc, w1s, ws2
    head_mask = layers0 + N_LAYERS * rows_per_layer
    block_sum = head_mask + R
    rep = block_sum + R
    w_rows = rep + R
    blayers = 3                               # bc, b1s, bs2
    brows_per_layer = 10                      # bq,bk,bv,bo,b1,b2,ln1g,ln1b,ln2g,ln2b
    bb = -(-(blayers + N_LAYERS * brows_per_layer) // 8) * 8
    b_rows = -(-(bb + N) // 8) * 8
    return SimpleNamespace(
        N=N, R=R,
        emb=0, wc=VOCAB, w1s=VOCAB + HIDDEN, ws2=VOCAB + 2 * HIDDEN,
        layers=layers0, rows_per_layer=rows_per_layer,
        head_mask=head_mask, block_sum=block_sum, rep=rep, w_rows=w_rows,
        bc=0, b1s=1, bs2=2, blayers=blayers, brows_per_layer=brows_per_layer,
        bb=bb, b_rows=b_rows)


def pack_params(parser, layers, B, S):
    """One-time host-side packing: weights -> bf16 [R,128] slab, biases/masks -> f32 slab."""
    L = _slab_layout(B, S)
    assert L.R <= LANES, "all (batch, head) key blocks must fit in one 128-lane tile"
    scale = 1.0 / math.sqrt(HEAD_DIM)

    def padw(w):                               # pad output columns to the 128-lane width
        w = np.asarray(w, np.float32)
        return np.pad(w, ((0, 0), (0, LANES - w.shape[1])))

    chunks = [padw(parser["emb"]), padw(parser["wc"]),
              padw(parser["w1"]), padw(parser["w2"])]
    for (wq, bq, wk, bk, wv, bv, wo, bo, ln1g, ln1b,
         w1, b1, w2, b2, ln2g, ln2b) in layers:
        chunks += [padw(wq * scale),           # fold 1/sqrt(head_dim) into Wq
                   padw(wk), padw(wv), padw(wo), padw(w1), padw(w2)]

    # Constant attention masks, hoisted out of the kernel.
    r = np.arange(L.R)
    head_mask = ((r[:, None] // S) % N_HEADS ==
                 (np.arange(HIDDEN)[None, :] // HEAD_DIM)).astype(np.float32)
    block_sum = ((r[:, None] // S) == (r[None, :] // S)).astype(np.float32)
    rep = ((r[:, None] // (N_HEADS * S)) * S + (r[:, None] % S) ==
           np.arange(L.N)[None, :]).astype(np.float32)      # [R, N] row-selection
    chunks += [padw(head_mask), padw(block_sum), padw(rep)]

    w_slab = jnp.asarray(np.concatenate(chunks, axis=0), dtype=jnp.bfloat16)
    assert w_slab.shape == (L.w_rows, LANES)

    def padrow(v):
        v = np.asarray(v, np.float32).reshape(1, -1)
        return np.pad(v, ((0, 0), (0, LANES - v.shape[1])))

    rows = [padrow(parser["bc"]), padrow(parser["b1"]), padrow(parser["b2"])]
    for (wq, bq, wk, bk, wv, bv, wo, bo, ln1g, ln1b,
         w1, b1, w2, b2, ln2g, ln2b) in layers:
        rows += [padrow(bq * scale), padrow(bk), padrow(bv), padrow(bo),
                 padrow(b1), padrow(b2), padrow(ln1g), padrow(ln1b),
                 padrow(ln2g), padrow(ln2b)]
    while len(rows) < L.bb:                    # 8-align the batch-mask block
        rows.append(np.zeros((1, LANES), np.float32))
    # additive cross-batch mask: 0 for same-batch (query row, key column), else -1e30
    rowb = np.arange(L.N) // S
    colb = np.arange(L.R) // (N_HEADS * S)
    bbias = np.where(rowb[:, None] == colb[None, :], 0.0, -1e30).astype(np.float32)
    rows.append(np.pad(bbias, ((0, 0), (0, LANES - L.R))))
    b_slab = np.concatenate(rows, axis=0)
    if b_slab.shape[0] < L.b_rows:
        b_slab = np.pad(b_slab, ((0, L.b_rows - b_slab.shape[0]), (0, 0)))
    return w_slab, jnp.asarray(b_slab, dtype=jnp.float32)


# ------------------- single fused forward-pass kernel ------------------
def _make_kernel(B, S):
    L = _slab_layout(B, S)
    N, R = L.N, L.R
    f32, bf16 = jnp.float32, jnp.bfloat16

    def kernel(x_ref, w_ref, b_ref, o_ref):
        def w(row, nrows, ncols=LANES):        # static slice of the bf16 weight slab
            return w_ref[row:row + nrows, 0:ncols]

        def bias(row, width):                  # one f32 bias/LN row
            return b_ref[row:row + 1, 0:width]

        def mm(a, wt):                         # bf16 at the MXU, f32 accumulation
            return jnp.dot(a.astype(bf16), wt, preferred_element_type=f32)

        x = x_ref[...]                                                 # [N, H] f32

        # ----- symbolic parsing: token classifier + structure gate -----
        logits = mm(x, w(L.wc, HIDDEN))[:, :VOCAB] + bias(L.bc, VOCAB)
        probs = _softmax_last(logits)
        weighted = mm(probs, w(L.emb, VOCAB))[:, :HIDDEN]
        sh = _gelu_exact(mm(x, w(L.w1s, HIDDEN))[:, :HIDDEN] + bias(L.b1s, HIDDEN))
        sl = mm(sh, w(L.ws2, HIDDEN))[:, :3] + bias(L.bs2, 3)
        sm = jnp.max(sl, axis=-1, keepdims=True)
        se = jnp.exp(sl - sm)
        p0 = se[:, 0:1] / jnp.sum(se, axis=-1, keepdims=True)          # [N, 1]
        x = weighted * p0 + x * (1.0 - p0)

        # ----- host-precomputed attention constants (no in-kernel iota) -----
        head_mask = w(L.head_mask, R, HIDDEN)          # [R, H]  bf16 0/1
        block_sum = w(L.block_sum, R, R)               # [R, R]  bf16 0/1
        rep_m = w(L.rep, R, N)                         # [R, N]  bf16 0/1 selection
        batch_bias = b_ref[L.bb:L.bb + N, 0:R]         # [N, R]  f32 {0, -1e30}

        def replicate(t):
            # [N, H] -> per-(batch, head) rows [R, H]; one tiny MXU matmul against
            # a constant selection matrix (no sublane concats), then head-mask.
            r = jnp.dot(rep_m, t.astype(bf16), preferred_element_type=f32)
            return r.astype(bf16) * head_mask

        # ----- integration layers: post-norm TransformerEncoderLayer -----
        for li in range(N_LAYERS):
            wr = L.layers + li * L.rows_per_layer
            br = L.blayers + li * L.brows_per_layer

            q = mm(x, w(wr + 0 * HIDDEN, HIDDEN))[:, :HIDDEN] + bias(br + 0, HIDDEN)
            k = mm(x, w(wr + 1 * HIDDEN, HIDDEN))[:, :HIDDEN] + bias(br + 1, HIDDEN)
            v = mm(x, w(wr + 2 * HIDDEN, HIDDEN))[:, :HIDDEN] + bias(br + 2, HIDDEN)

            k_rep = replicate(k)                                       # [R, H]
            v_rep = replicate(v)

            # all (batch, head) scores in ONE lane-dense [N, R] matmul
            scores = lax.dot_general(q.astype(bf16), k_rep,
                                     (((1,), (1,)), ((), ())),
                                     preferred_element_type=f32)
            scores = scores + batch_bias            # mask cross-batch key columns
            m = jnp.max(scores, axis=-1, keepdims=True)
            e = jnp.exp(scores - m)
            # per-(batch, head) softmax denominators via block-diagonal ones matmul
            denom = jnp.dot(e.astype(bf16), block_sum, preferred_element_type=f32)
            # clamp guards (a) masked cross-batch 0/0 columns and (b) the unlikely
            # case of a whole head block underflowing under the shared row max.
            p = e / jnp.maximum(denom, 1e-30)
            attn = jnp.dot(p.astype(bf16), v_rep, preferred_element_type=f32)  # [N, H]
            attn = mm(attn, w(wr + 3 * HIDDEN, HIDDEN))[:, :HIDDEN] + bias(br + 3, HIDDEN)

            y = _layer_norm(x + attn, bias(br + 6, HIDDEN), bias(br + 7, HIDDEN))
            h1 = _gelu_exact(mm(y, w(wr + 4 * HIDDEN, HIDDEN)) + bias(br + 4, FFN))
            ff = mm(h1, w(wr + 5 * HIDDEN, FFN))[:, :HIDDEN] + bias(br + 5, HIDDEN)
            x = _layer_norm(y + ff, bias(br + 8, HIDDEN), bias(br + 9, HIDDEN))

        o_ref[...] = x

    return kernel


# ----------------------------- wrapper ---------------------------------
def symbolic_expression_parser_forward(x, w_slab, b_slab):
    B, S, H = x.shape
    kernel = _make_kernel(B, S)
    # Gridless single invocation: 3 whole-array VMEM operands (x + 2 packed
    # slabs), no pipeline prologue/epilogue, one launch total.
    # TODO(synk): output last dim is 32 (<128 lanes) so final stores are masked;
    # at 2 KB of output this is negligible, so the lane-dense reshape was skipped.
    out2d = pl.pallas_call(
        kernel,
        out_shape=jax.ShapeDtypeStruct((B * S, H), jnp.float32),
    )(x.reshape(B * S, H), w_slab, b_slab)
    return out2d.reshape(B, S, H)


# ----------------------- parameter construction ------------------------
def _init_params(key):
    def nrm(k, shape, scale=0.02):
        return jax.random.normal(k, shape, dtype=jnp.float32) * scale

    keys = iter(jax.random.split(key, 64))

    parser = dict(
        emb=nrm(next(keys), (VOCAB, HIDDEN)),     # symbol_embedding.weight
        wc=nrm(next(keys), (HIDDEN, VOCAB)),      # token_classifier.weight.T
        bc=nrm(next(keys), (1, VOCAB)),
        w1=nrm(next(keys), (HIDDEN, HIDDEN)),     # structure_predictor[0].weight.T
        b1=nrm(next(keys), (1, HIDDEN)),
        w2=nrm(next(keys), (HIDDEN, 3)),          # structure_predictor[2].weight.T
        b2=nrm(next(keys), (1, 3)),
    )

    layers = []
    for _ in range(N_LAYERS):
        layers.append((
            nrm(next(keys), (HIDDEN, HIDDEN)), nrm(next(keys), (1, HIDDEN)),   # Wq^T, bq
            nrm(next(keys), (HIDDEN, HIDDEN)), nrm(next(keys), (1, HIDDEN)),   # Wk^T, bk
            nrm(next(keys), (HIDDEN, HIDDEN)), nrm(next(keys), (1, HIDDEN)),   # Wv^T, bv
            nrm(next(keys), (HIDDEN, HIDDEN)), nrm(next(keys), (1, HIDDEN)),   # Wo^T, bo
            jnp.ones((1, HIDDEN), jnp.float32), jnp.zeros((1, HIDDEN), jnp.float32),  # ln1
            nrm(next(keys), (HIDDEN, FFN)), nrm(next(keys), (1, FFN)),          # linear1
            nrm(next(keys), (FFN, HIDDEN)), nrm(next(keys), (1, HIDDEN)),       # linear2
            jnp.ones((1, HIDDEN), jnp.float32), jnp.zeros((1, HIDDEN), jnp.float32),  # ln2
        ))
    return parser, layers


if __name__ == "__main__":
    key = jax.random.PRNGKey(0)
    k_params, k_x = jax.random.split(key)
    parser, layers = _init_params(k_params)

    B, S = 2, 8
    # One-time host-side packing (outside jit): 2 slabs replace ~30 operands.
    w_slab, b_slab = pack_params(parser, layers, B, S)

    x = jax.random.normal(k_x, (B, S, HIDDEN), dtype=jnp.float32)

    fwd = jax.jit(symbolic_expression_parser_forward)
    out = jax.block_until_ready(fwd(x, w_slab, b_slab))
    assert out.shape == (B, S, HIDDEN) and out.dtype == jnp.float32
    assert bool(jnp.all(jnp.isfinite(out)))
    print("KERNEL_OK")
</pallas_src>

<mosaic_0001>
module attributes {stable_mosaic.version = 11 : i64} {
  func.func @kernel(%arg0: memref<16x32xf32, #tpu.memory_space<vmem>>, %arg1: memref<1120x128xbf16, #tpu.memory_space<vmem>>, %arg2: memref<40x128xf32, #tpu.memory_space<vmem>>, %arg3: memref<16x32xf32, #tpu.memory_space<vmem>>) attributes {dimension_semantics = [], scalar_prefetch = 0 : i64, scratch_operands = 0 : i64, tpu.core_type = #tpu.core_type<tc>} {
    %c0 = arith.constant 0 : index
    %c0_0 = arith.constant 0 : index
    %0 = vector.load %arg0[%c0, %c0_0] : memref<16x32xf32, #tpu.memory_space<vmem>>, vector<16x32xf32>
    %c64 = arith.constant 64 : index
    %c0_1 = arith.constant 0 : index
    %1 = vector.load %arg1[%c64, %c0_1] : memref<1120x128xbf16, #tpu.memory_space<vmem>>, vector<32x128xbf16>
    %2 = arith.truncf %0 : vector<16x32xf32> to vector<16x32xbf16>
    %cst = arith.constant dense<0.000000e+00> : vector<16x128xf32>
    %3 = tpu.matmul %2, %1, %cst {dimension_numbers = #tpu.dot_dimension_numbers<[1], [0], [0], [1], [0, 0, 1, 1], [], []>} : vector<16x32xbf16>, vector<32x128xbf16>, vector<16x128xf32> -> vector<16x128xf32>
    %4 = vector.extract_strided_slice %3 {offsets = [0, 0], sizes = [16, 64], strides = [1, 1]} : vector<16x128xf32> to vector<16x64xf32>
    %c0_2 = arith.constant 0 : index
    %c0_3 = arith.constant 0 : index
    %5 = vector.load %arg2[%c0_2, %c0_3] : memref<40x128xf32, #tpu.memory_space<vmem>>, vector<1x64xf32>
    %6 = vector.broadcast %5 : vector<1x64xf32> to vector<16x64xf32>
    %7 = arith.addf %4, %6 : vector<16x64xf32>
    %cst_4 = arith.constant dense<0xFF800000> : vector<16xf32>
    %8 = vector.multi_reduction <maximumf>, %7, %cst_4 [1] : vector<16x64xf32> to vector<16xf32>
    %9 = vector.shape_cast %8 : vector<16xf32> to vector<16x1xf32>
    %10 = vector.broadcast %9 : vector<16x1xf32> to vector<16x64xf32>
    %11 = arith.subf %7, %10 : vector<16x64xf32>
    %12 = math.exp %11 : vector<16x64xf32>
    %cst_5 = arith.constant dense<0.000000e+00> : vector<16xf32>
    %13 = vector.multi_reduction <add>, %12, %cst_5 [1] : vector<16x64xf32> to vector<16xf32>
    %14 = vector.shape_cast %13 : vector<16xf32> to vector<16x1xf32>
    %15 = vector.broadcast %14 : vector<16x1xf32> to vector<16x64xf32>
    %16 = arith.divf %12, %15 : vector<16x64xf32>
    %c0_6 = arith.constant 0 : index
    %c0_7 = arith.constant 0 : index
    %17 = vector.load %arg1[%c0_6, %c0_7] : memref<1120x128xbf16, #tpu.memory_space<vmem>>, vector<64x128xbf16>
    %18 = arith.truncf %16 : vector<16x64xf32> to vector<16x64xbf16>
    %cst_8 = arith.constant dense<0.000000e+00> : vector<16x128xf32>
    %19 = tpu.matmul %18, %17, %cst_8 {dimension_numbers = #tpu.dot_dimension_numbers<[1], [0], [0], [1], [0, 0, 1, 1], [], []>} : vector<16x64xbf16>, vector<64x128xbf16>, vector<16x128xf32> -> vector<16x128xf32>
    %20 = vector.extract_strided_slice %19 {offsets = [0, 0], sizes = [16, 32], strides = [1, 1]} : vector<16x128xf32> to vector<16x32xf32>
    %c96 = arith.constant 96 : index
    %c0_9 = arith.constant 0 : index
    %21 = vector.load %arg1[%c96, %c0_9] : memref<1120x128xbf16, #tpu.memory_space<vmem>>, vector<32x128xbf16>
    %22 = arith.truncf %0 : vector<16x32xf32> to vector<16x32xbf16>
    %cst_10 = arith.constant dense<0.000000e+00> : vector<16x128xf32>
    %23 = tpu.matmul %22, %21, %cst_10 {dimension_numbers = #tpu.dot_dimension_numbers<[1], [0], [0], [1], [0, 0, 1, 1], [], []>} : vector<16x32xbf16>, vector<32x128xbf16>, vector<16x128xf32> -> vector<16x128xf32>
    %24 = vector.extract_strided_slice %23 {offsets = [0, 0], sizes = [16, 32], strides = [1, 1]} : vector<16x128xf32> to vector<16x32xf32>
    %c1 = arith.constant 1 : index
    %c0_11 = arith.constant 0 : index
    %25 = vector.load %arg2[%c1, %c0_11] : memref<40x128xf32, #tpu.memory_space<vmem>>, vector<1x32xf32>
    %26 = vector.broadcast %25 : vector<1x32xf32> to vector<16x32xf32>
    %27 = arith.addf %24, %26 : vector<16x32xf32>
    %cst_12 = arith.constant 5.000000e-01 : f32
    %28 = vector.broadcast %cst_12 : f32 to vector<16x32xf32>
    %29 = arith.mulf %28, %27 : vector<16x32xf32>
    %cst_13 = arith.constant 0.707106769 : f32
    %30 = vector.broadcast %cst_13 : f32 to vector<16x32xf32>
    %31 = arith.mulf %27, %30 : vector<16x32xf32>
    %32 = math.erf %31 : vector<16x32xf32>
    %cst_14 = arith.constant 1.000000e+00 : f32
    %33 = vector.broadcast %cst_14 : f32 to vector<16x32xf32>
    %34 = arith.addf %33, %32 : vector<16x32xf32>
    %35 = arith.mulf %29, %34 : vector<16x32xf32>
    %c128 = arith.constant 128 : index
    %c0_15 = arith.constant 0 : index
    %36 = vector.load %arg1[%c128, %c0_15] : memref<1120x128xbf16, #tpu.memory_space<vmem>>, vector<32x128xbf16>
    %37 = arith.truncf %35 : vector<16x32xf32> to vector<16x32xbf16>
    %cst_16 = arith.constant dense<0.000000e+00> : vector<16x128xf32>
    %38 = tpu.matmul %37, %36, %cst_16 {dimension_numbers = #tpu.dot_dimension_numbers<[1], [0], [0], [1], [0, 0, 1, 1], [], []>} : vector<16x32xbf16>, vector<32x128xbf16>, vector<16x128xf32> -> vector<16x128xf32>
    %39 = vector.extract_strided_slice %38 {offsets = [0, 0], sizes = [16, 3], strides = [1, 1]} : vector<16x128xf32> to vector<16x3xf32>
    %c2 = arith.constant 2 : index
    %c0_17 = arith.constant 0 : index
    %40 = vector.load %arg2[%c2, %c0_17] : memref<40x128xf32, #tpu.memory_space<vmem>>, vector<1x3xf32>
    %41 = vector.broadcast %40 : vector<1x3xf32> to vector<16x3xf32>
    %42 = arith.addf %39, %41 : vector<16x3xf32>
    %cst_18 = arith.constant dense<0xFF800000> : vector<16xf32>
    %43 = vector.multi_reduction <maximumf>, %42, %cst_18 [1] : vector<16x3xf32> to vector<16xf32>
    %44 = vector.shape_cast %43 : vector<16xf32> to vector<16x1xf32>
    %45 = vector.broadcast %44 : vector<16x1xf32> to vector<16x3xf32>
    %46 = arith.subf %42, %45 : vector<16x3xf32>
    %47 = math.exp %46 : vector<16x3xf32>
    %48 = vector.extract_strided_slice %47 {offsets = [0, 0], sizes = [16, 1], strides = [1, 1]} : vector<16x3xf32> to vector<16x1xf32>
    %cst_19 = arith.constant dense<0.000000e+00> : vector<16xf32>
    %49 = vector.multi_reduction <add>, %47, %cst_19 [1] : vector<16x3xf32> to vector<16xf32>
    %50 = vector.shape_cast %49 : vector<16xf32> to vector<16x1xf32>
    %51 = arith.divf %48, %50 : vector<16x1xf32>
    %52 = vector.broadcast %51 : vector<16x1xf32> to vector<16x32xf32>
    %53 = arith.mulf %20, %52 : vector<16x32xf32>
    %cst_20 = arith.constant 1.000000e+00 : f32
    %54 = vector.broadcast %cst_20 : f32 to vector<16x1xf32>
    %55 = arith.subf %54, %51 : vector<16x1xf32>
    %56 = vector.broadcast %55 : vector<16x1xf32> to vector<16x32xf32>
    %57 = arith.mulf %0, %56 : vector<16x32xf32>
    %58 = arith.addf %53, %57 : vector<16x32xf32>
    %c736 = arith.constant 736 : index
    %c0_21 = arith.constant 0 : index
    %59 = vector.load %arg1[%c736, %c0_21] : memref<1120x128xbf16, #tpu.memory_space<vmem>>, vector<128x32xbf16>
    %c864 = arith.constant 864 : index
    %c0_22 = arith.constant 0 : index
    %60 = vector.load %arg1[%c864, %c0_22] : memref<1120x128xbf16, #tpu.memory_space<vmem>>, vector<128x128xbf16>
    %c992 = arith.constant 992 : index
    %c0_23 = arith.constant 0 : index
    %61 = vector.load %arg1[%c992, %c0_23] : memref<1120x128xbf16, #tpu.memory_space<vmem>>, vector<128x16xbf16>
    %c24 = arith.constant 24 : index
    %c0_24 = arith.constant 0 : index
    %62 = vector.load %arg2[%c24, %c0_24] : memref<40x128xf32, #tpu.memory_space<vmem>>, vector<16x128xf32>
    %c160 = arith.constant 160 : index
    %c0_25 = arith.constant 0 : index
    %63 = vector.load %arg1[%c160, %c0_25] : memref<1120x128xbf16, #tpu.memory_space<vmem>>, vector<32x128xbf16>
    %64 = arith.truncf %58 : vector<16x32xf32> to vector<16x32xbf16>
    %cst_26 = arith.constant dense<0.000000e+00> : vector<16x128xf32>
    %65 = tpu.matmul %64, %63, %cst_26 {dimension_numbers = #tpu.dot_dimension_numbers<[1], [0], [0], [1], [0, 0, 1, 1], [], []>} : vector<16x32xbf16>, vector<32x128xbf16>, vector<16x128xf32> -> vector<16x128xf32>
    %66 = vector.extract_strided_slice %65 {offsets = [0, 0], sizes = [16, 32], strides = [1, 1]} : vector<16x128xf32> to vector<16x32xf32>
    %c3 = arith.constant 3 : index
    %c0_27 = arith.constant 0 : index
    %67 = vector.load %arg2[%c3, %c0_27] : memref<40x128xf32, #tpu.memory_space<vmem>>, vector<1x32xf32>
    %68 = vector.broadcast %67 : vector<1x32xf32> to vector<16x32xf32>
    %69 = arith.addf %66, %68 : vector<16x32xf32>
    %c192 = arith.constant 192 : index
    %c0_28 = arith.constant 0 : index
    %70 = vector.load %arg1[%c192, %c0_28] : memref<1120x128xbf16, #tpu.memory_space<vmem>>, vector<32x128xbf16>
    %71 = arith.truncf %58 : vector<16x32xf32> to vector<16x32xbf16>
    %cst_29 = arith.constant dense<0.000000e+00> : vector<16x128xf32>
    %72 = tpu.matmul %71, %70, %cst_29 {dimension_numbers = #tpu.dot_dimension_numbers<[1], [0], [0], [1], [0, 0, 1, 1], [], []>} : vector<16x32xbf16>, vector<32x128xbf16>, vector<16x128xf32> -> vector<16x128xf32>
    %73 = vector.extract_strided_slice %72 {offsets = [0, 0], sizes = [16, 32], strides = [1, 1]} : vector<16x128xf32> to vector<16x32xf32>
    %c4 = arith.constant 4 : index
    %c0_30 = arith.constant 0 : index
    %74 = vector.load %arg2[%c4, %c0_30] : memref<40x128xf32, #tpu.memory_space<vmem>>, vector<1x32xf32>
    %75 = vector.broadcast %74 : vector<1x32xf32> to vector<16x32xf32>
    %76 = arith.addf %73, %75 : vector<16x32xf32>
    %c224 = arith.constant 224 : index
    %c0_31 = arith.constant 0 : index
    %77 = vector.load %arg1[%c224, %c0_31] : memref<1120x128xbf16, #tpu.memory_space<vmem>>, vector<32x128xbf16>
    %78 = arith.truncf %58 : vector<16x32xf32> to vector<16x32xbf16>
    %cst_32 = arith.constant dense<0.000000e+00> : vector<16x128xf32>
    %79 = tpu.matmul %78, %77, %cst_32 {dimension_numbers = #tpu.dot_dimension_numbers<[1], [0], [0], [1], [0, 0, 1, 1], [], []>} : vector<16x32xbf16>, vector<32x128xbf16>, vector<16x128xf32> -> vector<16x128xf32>
    %80 = vector.extract_strided_slice %79 {offsets = [0, 0], sizes = [16, 32], strides = [1, 1]} : vector<16x128xf32> to vector<16x32xf32>
    %c5 = arith.constant 5 : index
    %c0_33 = arith.constant 0 : index
    %81 = vector.load %arg2[%c5, %c0_33] : memref<40x128xf32, #tpu.memory_space<vmem>>, vector<1x32xf32>
    %82 = vector.broadcast %81 : vector<1x32xf32> to vector<16x32xf32>
    %83 = arith.addf %80, %82 : vector<16x32xf32>
    %84 = arith.truncf %76 : vector<16x32xf32> to vector<16x32xbf16>
    %cst_34 = arith.constant dense<0.000000e+00> : vector<128x32xf32>
    %85 = tpu.matmul %61, %84, %cst_34 {dimension_numbers = #tpu.dot_dimension_numbers<[1], [0], [0], [1], [0, 0, 1, 1], [], []>} : vector<128x16xbf16>, vector<16x32xbf16>, vector<128x32xf32> -> vector<128x32xf32>
    %86 = arith.truncf %85 : vector<128x32xf32> to vector<128x32xbf16>
    %87 = arith.mulf %86, %59 : vector<128x32xbf16>
    %88 = arith.truncf %83 : vector<16x32xf32> to vector<16x32xbf16>
    %cst_35 = arith.constant dense<0.000000e+00> : vector<128x32xf32>
    %89 = tpu.matmul %61, %88, %cst_35 {dimension_numbers = #tpu.dot_dimension_numbers<[1], [0], [0], [1], [0, 0, 1, 1], [], []>} : vector<128x16xbf16>, vector<16x32xbf16>, vector<128x32xf32> -> vector<128x32xf32>
    %90 = arith.truncf %89 : vector<128x32xf32> to vector<128x32xbf16>
    %91 = arith.mulf %90, %59 : vector<128x32xbf16>
    %92 = arith.truncf %69 : vector<16x32xf32> to vector<16x32xbf16>
    %cst_36 = arith.constant dense<0.000000e+00> : vector<16x128xf32>
    %93 = tpu.matmul %92, %87, %cst_36 {dimension_numbers = #tpu.dot_dimension_numbers<[1], [1], [0], [0], [0, 0, 1, 0], [], []>} : vector<16x32xbf16>, vector<128x32xbf16>, vector<16x128xf32> -> vector<16x128xf32>
    %94 = arith.addf %93, %62 : vector<16x128xf32>
    %cst_37 = arith.constant dense<0xFF800000> : vector<16xf32>
    %95 = vector.multi_reduction <maximumf>, %94, %cst_37 [1] : vector<16x128xf32> to vector<16xf32>
    %96 = vector.shape_cast %95 : vector<16xf32> to vector<16x1xf32>
    %97 = vector.broadcast %96 : vector<16x1xf32> to vector<16x128xf32>
    %98 = arith.subf %94, %97 : vector<16x128xf32>
    %99 = math.exp %98 : vector<16x128xf32>
    %100 = arith.truncf %99 : vector<16x128xf32> to vector<16x128xbf16>
    %cst_38 = arith.constant dense<0.000000e+00> : vector<16x128xf32>
    %101 = tpu.matmul %100, %60, %cst_38 {dimension_numbers = #tpu.dot_dimension_numbers<[1], [0], [0], [1], [0, 0, 1, 1], [], []>} : vector<16x128xbf16>, vector<128x128xbf16>, vector<16x128xf32> -> vector<16x128xf32>
    %cst_39 = arith.constant 1.000000e-30 : f32
    %102 = vector.broadcast %cst_39 : f32 to vector<16x128xf32>
    %103 = arith.maximumf %101, %102 : vector<16x128xf32>
    %104 = arith.divf %99, %103 : vector<16x128xf32>
    %105 = arith.truncf %104 : vector<16x128xf32> to vector<16x128xbf16>
    %cst_40 = arith.constant dense<0.000000e+00> : vector<16x32xf32>
    %106 = tpu.matmul %105, %91, %cst_40 {dimension_numbers = #tpu.dot_dimension_numbers<[1], [0], [0], [1], [0, 0, 1, 1], [], []>} : vector<16x128xbf16>, vector<128x32xbf16>, vector<16x32xf32> -> vector<16x32xf32>
    %c256 = arith.constant 256 : index
    %c0_41 = arith.constant 0 : index
    %107 = vector.load %arg1[%c256, %c0_41] : memref<1120x128xbf16, #tpu.memory_space<vmem>>, vector<32x128xbf16>
    %108 = arith.truncf %106 : vector<16x32xf32> to vector<16x32xbf16>
    %cst_42 = arith.constant dense<0.000000e+00> : vector<16x128xf32>
    %109 = tpu.matmul %108, %107, %cst_42 {dimension_numbers = #tpu.dot_dimension_numbers<[1], [0], [0], [1], [0, 0, 1, 1], [], []>} : vector<16x32xbf16>, vector<32x128xbf16>, vector<16x128xf32> -> vector<16x128xf32>
    %110 = vector.extract_strided_slice %109 {offsets = [0, 0], sizes = [16, 32], strides = [1, 1]} : vector<16x128xf32> to vector<16x32xf32>
    %c6 = arith.constant 6 : index
    %c0_43 = arith.constant 0 : index
    %111 = vector.load %arg2[%c6, %c0_43] : memref<40x128xf32, #tpu.memory_space<vmem>>, vector<1x32xf32>
    %112 = vector.broadcast %111 : vector<1x32xf32> to vector<16x32xf32>
    %113 = arith.addf %110, %112 : vector<16x32xf32>
    %114 = arith.addf %58, %113 : vector<16x32xf32>
    %c9 = arith.constant 9 : index
    %c0_44 = arith.constant 0 : index
    %115 = vector.load %arg2[%c9, %c0_44] : memref<40x128xf32, #tpu.memory_space<vmem>>, vector<1x32xf32>
    %c10 = arith.constant 10 : index
    %c0_45 = arith.constant 0 : index
    %116 = vector.load %arg2[%c10, %c0_45] : memref<40x128xf32, #tpu.memory_space<vmem>>, vector<1x32xf32>
    %cst_46 = arith.constant dense<0.000000e+00> : vector<16xf32>
    %117 = vector.multi_reduction <add>, %114, %cst_46 [1] : vector<16x32xf32> to vector<16xf32>
    %118 = vector.shape_cast %117 : vector<16xf32> to vector<16x1xf32>
    %cst_47 = arith.constant 3.200000e+01 : f32
    %119 = vector.broadcast %cst_47 : f32 to vector<16x1xf32>
    %120 = arith.divf %118, %119 : vector<16x1xf32>
    %121 = vector.broadcast %120 : vector<16x1xf32> to vector<16x32xf32>
    %122 = arith.subf %114, %121 : vector<16x32xf32>
    %123 = arith.mulf %122, %122 : vector<16x32xf32>
    %cst_48 = arith.constant dense<0.000000e+00> : vector<16xf32>
    %124 = vector.multi_reduction <add>, %123, %cst_48 [1] : vector<16x32xf32> to vector<16xf32>
    %125 = vector.shape_cast %124 : vector<16xf32> to vector<16x1xf32>
    %cst_49 = arith.constant 3.200000e+01 : f32
    %126 = vector.broadcast %cst_49 : f32 to vector<16x1xf32>
    %127 = arith.divf %125, %126 : vector<16x1xf32>
    %128 = vector.broadcast %120 : vector<16x1xf32> to vector<16x32xf32>
    %129 = arith.subf %114, %128 : vector<16x32xf32>
    %cst_50 = arith.constant 9.99999974E-6 : f32
    %130 = vector.broadcast %cst_50 : f32 to vector<16x1xf32>
    %131 = arith.addf %127, %130 : vector<16x1xf32>
    %132 = math.rsqrt %131 : vector<16x1xf32>
    %133 = vector.broadcast %132 : vector<16x1xf32> to vector<16x32xf32>
    %134 = arith.mulf %129, %133 : vector<16x32xf32>
    %135 = vector.broadcast %115 : vector<1x32xf32> to vector<16x32xf32>
    %136 = arith.mulf %134, %135 : vector<16x32xf32>
    %137 = vector.broadcast %116 : vector<1x32xf32> to vector<16x32xf32>
    %138 = arith.addf %136, %137 : vector<16x32xf32>
    %c288 = arith.constant 288 : index
    %c0_51 = arith.constant 0 : index
    %139 = vector.load %arg1[%c288, %c0_51] : memref<1120x128xbf16, #tpu.memory_space<vmem>>, vector<32x128xbf16>
    %140 = arith.truncf %138 : vector<16x32xf32> to vector<16x32xbf16>
    %cst_52 = arith.constant dense<0.000000e+00> : vector<16x128xf32>
    %141 = tpu.matmul %140, %139, %cst_52 {dimension_numbers = #tpu.dot_dimension_numbers<[1], [0], [0], [1], [0, 0, 1, 1], [], []>} : vector<16x32xbf16>, vector<32x128xbf16>, vector<16x128xf32> -> vector<16x128xf32>
    %c7 = arith.constant 7 : index
    %c0_53 = arith.constant 0 : index
    %142 = vector.load %arg2[%c7, %c0_53] : memref<40x128xf32, #tpu.memory_space<vmem>>, vector<1x128xf32>
    %143 = vector.broadcast %142 : vector<1x128xf32> to vector<16x128xf32>
    %144 = arith.addf %141, %143 : vector<16x128xf32>
    %cst_54 = arith.constant 5.000000e-01 : f32
    %145 = vector.broadcast %cst_54 : f32 to vector<16x128xf32>
    %146 = arith.mulf %145, %144 : vector<16x128xf32>
    %cst_55 = arith.constant 0.707106769 : f32
    %147 = vector.broadcast %cst_55 : f32 to vector<16x128xf32>
    %148 = arith.mulf %144, %147 : vector<16x128xf32>
    %149 = math.erf %148 : vector<16x128xf32>
    %cst_56 = arith.constant 1.000000e+00 : f32
    %150 = vector.broadcast %cst_56 : f32 to vector<16x128xf32>
    %151 = arith.addf %150, %149 : vector<16x128xf32>
    %152 = arith.mulf %146, %151 : vector<16x128xf32>
    %c320 = arith.constant 320 : index
    %c0_57 = arith.constant 0 : index
    %153 = vector.load %arg1[%c320, %c0_57] : memref<1120x128xbf16, #tpu.memory_space<vmem>>, vector<128x128xbf16>
    %154 = arith.truncf %152 : vector<16x128xf32> to vector<16x128xbf16>
    %cst_58 = arith.constant dense<0.000000e+00> : vector<16x128xf32>
    %155 = tpu.matmul %154, %153, %cst_58 {dimension_numbers = #tpu.dot_dimension_numbers<[1], [0], [0], [1], [0, 0, 1, 1], [], []>} : vector<16x128xbf16>, vector<128x128xbf16>, vector<16x128xf32> -> vector<16x128xf32>
    %156 = vector.extract_strided_slice %155 {offsets = [0, 0], sizes = [16, 32], strides = [1, 1]} : vector<16x128xf32> to vector<16x32xf32>
    %c8 = arith.constant 8 : index
    %c0_59 = arith.constant 0 : index
    %157 = vector.load %arg2[%c8, %c0_59] : memref<40x128xf32, #tpu.memory_space<vmem>>, vector<1x32xf32>
    %158 = vector.broadcast %157 : vector<1x32xf32> to vector<16x32xf32>
    %159 = arith.addf %156, %158 : vector<16x32xf32>
    %160 = arith.addf %138, %159 : vector<16x32xf32>
    %c11 = arith.constant 11 : index
    %c0_60 = arith.constant 0 : index
    %161 = vector.load %arg2[%c11, %c0_60] : memref<40x128xf32, #tpu.memory_space<vmem>>, vector<1x32xf32>
    %c12 = arith.constant 12 : index
    %c0_61 = arith.constant 0 : index
    %162 = vector.load %arg2[%c12, %c0_61] : memref<40x128xf32, #tpu.memory_space<vmem>>, vector<1x32xf32>
    %cst_62 = arith.constant dense<0.000000e+00> : vector<16xf32>
    %163 = vector.multi_reduction <add>, %160, %cst_62 [1] : vector<16x32xf32> to vector<16xf32>
    %164 = vector.shape_cast %163 : vector<16xf32> to vector<16x1xf32>
    %cst_63 = arith.constant 3.200000e+01 : f32
    %165 = vector.broadcast %cst_63 : f32 to vector<16x1xf32>
    %166 = arith.divf %164, %165 : vector<16x1xf32>
    %167 = vector.broadcast %166 : vector<16x1xf32> to vector<16x32xf32>
    %168 = arith.subf %160, %167 : vector<16x32xf32>
    %169 = arith.mulf %168, %168 : vector<16x32xf32>
    %cst_64 = arith.constant dense<0.000000e+00> : vector<16xf32>
    %170 = vector.multi_reduction <add>, %169, %cst_64 [1] : vector<16x32xf32> to vector<16xf32>
    %171 = vector.shape_cast %170 : vector<16xf32> to vector<16x1xf32>
    %cst_65 = arith.constant 3.200000e+01 : f32
    %172 = vector.broadcast %cst_65 : f32 to vector<16x1xf32>
    %173 = arith.divf %171, %172 : vector<16x1xf32>
    %174 = vector.broadcast %166 : vector<16x1xf32> to vector<16x32xf32>
    %175 = arith.subf %160, %174 : vector<16x32xf32>
    %cst_66 = arith.constant 9.99999974E-6 : f32
    %176 = vector.broadcast %cst_66 : f32 to vector<16x1xf32>
    %177 = arith.addf %173, %176 : vector<16x1xf32>
    %178 = math.rsqrt %177 : vector<16x1xf32>
    %179 = vector.broadcast %178 : vector<16x1xf32> to vector<16x32xf32>
    %180 = arith.mulf %175, %179 : vector<16x32xf32>
    %181 = vector.broadcast %161 : vector<1x32xf32> to vector<16x32xf32>
    %182 = arith.mulf %180, %181 : vector<16x32xf32>
    %183 = vector.broadcast %162 : vector<1x32xf32> to vector<16x32xf32>
    %184 = arith.addf %182, %183 : vector<16x32xf32>
    %c448 = arith.constant 448 : index
    %c0_67 = arith.constant 0 : index
    %185 = vector.load %arg1[%c448, %c0_67] : memref<1120x128xbf16, #tpu.memory_space<vmem>>, vector<32x128xbf16>
    %186 = arith.truncf %184 : vector<16x32xf32> to vector<16x32xbf16>
    %cst_68 = arith.constant dense<0.000000e+00> : vector<16x128xf32>
    %187 = tpu.matmul %186, %185, %cst_68 {dimension_numbers = #tpu.dot_dimension_numbers<[1], [0], [0], [1], [0, 0, 1, 1], [], []>} : vector<16x32xbf16>, vector<32x128xbf16>, vector<16x128xf32> -> vector<16x128xf32>
    %188 = vector.extract_strided_slice %187 {offsets = [0, 0], sizes = [16, 32], strides = [1, 1]} : vector<16x128xf32> to vector<16x32xf32>
    %c13 = arith.constant 13 : index
    %c0_69 = arith.constant 0 : index
    %189 = vector.load %arg2[%c13, %c0_69] : memref<40x128xf32, #tpu.memory_space<vmem>>, vector<1x32xf32>
    %190 = vector.broadcast %189 : vector<1x32xf32> to vector<16x32xf32>
    %191 = arith.addf %188, %190 : vector<16x32xf32>
    %c480 = arith.constant 480 : index
    %c0_70 = arith.constant 0 : index
    %192 = vector.load %arg1[%c480, %c0_70] : memref<1120x128xbf16, #tpu.memory_space<vmem>>, vector<32x128xbf16>
    %193 = arith.truncf %184 : vector<16x32xf32> to vector<16x32xbf16>
    %cst_71 = arith.constant dense<0.000000e+00> : vector<16x128xf32>
    %194 = tpu.matmul %193, %192, %cst_71 {dimension_numbers = #tpu.dot_dimension_numbers<[1], [0], [0], [1], [0, 0, 1, 1], [], []>} : vector<16x32xbf16>, vector<32x128xbf16>, vector<16x128xf32> -> vector<16x128xf32>
    %195 = vector.extract_strided_slice %194 {offsets = [0, 0], sizes = [16, 32], strides = [1, 1]} : vector<16x128xf32> to vector<16x32xf32>
    %c14 = arith.constant 14 : index
    %c0_72 = arith.constant 0 : index
    %196 = vector.load %arg2[%c14, %c0_72] : memref<40x128xf32, #tpu.memory_space<vmem>>, vector<1x32xf32>
    %197 = vector.broadcast %196 : vector<1x32xf32> to vector<16x32xf32>
    %198 = arith.addf %195, %197 : vector<16x32xf32>
    %c512 = arith.constant 512 : index
    %c0_73 = arith.constant 0 : index
    %199 = vector.load %arg1[%c512, %c0_73] : memref<1120x128xbf16, #tpu.memory_space<vmem>>, vector<32x128xbf16>
    %200 = arith.truncf %184 : vector<16x32xf32> to vector<16x32xbf16>
    %cst_74 = arith.constant dense<0.000000e+00> : vector<16x128xf32>
    %201 = tpu.matmul %200, %199, %cst_74 {dimension_numbers = #tpu.dot_dimension_numbers<[1], [0], [0], [1], [0, 0, 1, 1], [], []>} : vector<16x32xbf16>, vector<32x128xbf16>, vector<16x128xf32> -> vector<16x128xf32>
    %202 = vector.extract_strided_slice %201 {offsets = [0, 0], sizes = [16, 32], strides = [1, 1]} : vector<16x128xf32> to vector<16x32xf32>
    %c15 = arith.constant 15 : index
    %c0_75 = arith.constant 0 : index
    %203 = vector.load %arg2[%c15, %c0_75] : memref<40x128xf32, #tpu.memory_space<vmem>>, vector<1x32xf32>
    %204 = vector.broadcast %203 : vector<1x32xf32> to vector<16x32xf32>
    %205 = arith.addf %202, %204 : vector<16x32xf32>
    %206 = arith.truncf %198 : vector<16x32xf32> to vector<16x32xbf16>
    %cst_76 = arith.constant dense<0.000000e+00> : vector<128x32xf32>
    %207 = tpu.matmul %61, %206, %cst_76 {dimension_numbers = #tpu.dot_dimension_numbers<[1], [0], [0], [1], [0, 0, 1, 1], [], []>} : vector<128x16xbf16>, vector<16x32xbf16>, vector<128x32xf32> -> vector<128x32xf32>
    %208 = arith.truncf %207 : vector<128x32xf32> to vector<128x32xbf16>
    %209 = arith.mulf %208, %59 : vector<128x32xbf16>
    %210 = arith.truncf %205 : vector<16x32xf32> to vector<16x32xbf16>
    %cst_77 = arith.constant dense<0.000000e+00> : vector<128x32xf32>
    %211 = tpu.matmul %61, %210, %cst_77 {dimension_numbers = #tpu.dot_dimension_numbers<[1], [0], [0], [1], [0, 0, 1, 1], [], []>} : vector<128x16xbf16>, vector<16x32xbf16>, vector<128x32xf32> -> vector<128x32xf32>
    %212 = arith.truncf %211 : vector<128x32xf32> to vector<128x32xbf16>
    %213 = arith.mulf %212, %59 : vector<128x32xbf16>
    %214 = arith.truncf %191 : vector<16x32xf32> to vector<16x32xbf16>
    %cst_78 = arith.constant dense<0.000000e+00> : vector<16x128xf32>
    %215 = tpu.matmul %214, %209, %cst_78 {dimension_numbers = #tpu.dot_dimension_numbers<[1], [1], [0], [0], [0, 0, 1, 0], [], []>} : vector<16x32xbf16>, vector<128x32xbf16>, vector<16x128xf32> -> vector<16x128xf32>
    %216 = arith.addf %215, %62 : vector<16x128xf32>
    %cst_79 = arith.constant dense<0xFF800000> : vector<16xf32>
    %217 = vector.multi_reduction <maximumf>, %216, %cst_79 [1] : vector<16x128xf32> to vector<16xf32>
    %218 = vector.shape_cast %217 : vector<16xf32> to vector<16x1xf32>
    %219 = vector.broadcast %218 : vector<16x1xf32> to vector<16x128xf32>
    %220 = arith.subf %216, %219 : vector<16x128xf32>
    %221 = math.exp %220 : vector<16x128xf32>
    %222 = arith.truncf %221 : vector<16x128xf32> to vector<16x128xbf16>
    %cst_80 = arith.constant dense<0.000000e+00> : vector<16x128xf32>
    %223 = tpu.matmul %222, %60, %cst_80 {dimension_numbers = #tpu.dot_dimension_numbers<[1], [0], [0], [1], [0, 0, 1, 1], [], []>} : vector<16x128xbf16>, vector<128x128xbf16>, vector<16x128xf32> -> vector<16x128xf32>
    %cst_81 = arith.constant 1.000000e-30 : f32
    %224 = vector.broadcast %cst_81 : f32 to vector<16x128xf32>
    %225 = arith.maximumf %223, %224 : vector<16x128xf32>
    %226 = arith.divf %221, %225 : vector<16x128xf32>
    %227 = arith.truncf %226 : vector<16x128xf32> to vector<16x128xbf16>
    %cst_82 = arith.constant dense<0.000000e+00> : vector<16x32xf32>
    %228 = tpu.matmul %227, %213, %cst_82 {dimension_numbers = #tpu.dot_dimension_numbers<[1], [0], [0], [1], [0, 0, 1, 1], [], []>} : vector<16x128xbf16>, vector<128x32xbf16>, vector<16x32xf32> -> vector<16x32xf32>
    %c544 = arith.constant 544 : index
    %c0_83 = arith.constant 0 : index
    %229 = vector.load %arg1[%c544, %c0_83] : memref<1120x128xbf16, #tpu.memory_space<vmem>>, vector<32x128xbf16>
    %230 = arith.truncf %228 : vector<16x32xf32> to vector<16x32xbf16>
    %cst_84 = arith.constant dense<0.000000e+00> : vector<16x128xf32>
    %231 = tpu.matmul %230, %229, %cst_84 {dimension_numbers = #tpu.dot_dimension_numbers<[1], [0], [0], [1], [0, 0, 1, 1], [], []>} : vector<16x32xbf16>, vector<32x128xbf16>, vector<16x128xf32> -> vector<16x128xf32>
    %232 = vector.extract_strided_slice %231 {offsets = [0, 0], sizes = [16, 32], strides = [1, 1]} : vector<16x128xf32> to vector<16x32xf32>
    %c16 = arith.constant 16 : index
    %c0_85 = arith.constant 0 : index
    %233 = vector.load %arg2[%c16, %c0_85] : memref<40x128xf32, #tpu.memory_space<vmem>>, vector<1x32xf32>
    %234 = vector.broadcast %233 : vector<1x32xf32> to vector<16x32xf32>
    %235 = arith.addf %232, %234 : vector<16x32xf32>
    %236 = arith.addf %184, %235 : vector<16x32xf32>
    %c19 = arith.constant 19 : index
    %c0_86 = arith.constant 0 : index
    %237 = vector.load %arg2[%c19, %c0_86] : memref<40x128xf32, #tpu.memory_space<vmem>>, vector<1x32xf32>
    %c20 = arith.constant 20 : index
    %c0_87 = arith.constant 0 : index
    %238 = vector.load %arg2[%c20, %c0_87] : memref<40x128xf32, #tpu.memory_space<vmem>>, vector<1x32xf32>
    %cst_88 = arith.constant dense<0.000000e+00> : vector<16xf32>
    %239 = vector.multi_reduction <add>, %236, %cst_88 [1] : vector<16x32xf32> to vector<16xf32>
    %240 = vector.shape_cast %239 : vector<16xf32> to vector<16x1xf32>
    %cst_89 = arith.constant 3.200000e+01 : f32
    %241 = vector.broadcast %cst_89 : f32 to vector<16x1xf32>
    %242 = arith.divf %240, %241 : vector<16x1xf32>
    %243 = vector.broadcast %242 : vector<16x1xf32> to vector<16x32xf32>
    %244 = arith.subf %236, %243 : vector<16x32xf32>
    %245 = arith.mulf %244, %244 : vector<16x32xf32>
    %cst_90 = arith.constant dense<0.000000e+00> : vector<16xf32>
    %246 = vector.multi_reduction <add>, %245, %cst_90 [1] : vector<16x32xf32> to vector<16xf32>
    %247 = vector.shape_cast %246 : vector<16xf32> to vector<16x1xf32>
    %cst_91 = arith.constant 3.200000e+01 : f32
    %248 = vector.broadcast %cst_91 : f32 to vector<16x1xf32>
    %249 = arith.divf %247, %248 : vector<16x1xf32>
    %250 = vector.broadcast %242 : vector<16x1xf32> to vector<16x32xf32>
    %251 = arith.subf %236, %250 : vector<16x32xf32>
    %cst_92 = arith.constant 9.99999974E-6 : f32
    %252 = vector.broadcast %cst_92 : f32 to vector<16x1xf32>
    %253 = arith.addf %249, %252 : vector<16x1xf32>
    %254 = math.rsqrt %253 : vector<16x1xf32>
    %255 = vector.broadcast %254 : vector<16x1xf32> to vector<16x32xf32>
    %256 = arith.mulf %251, %255 : vector<16x32xf32>
    %257 = vector.broadcast %237 : vector<1x32xf32> to vector<16x32xf32>
    %258 = arith.mulf %256, %257 : vector<16x32xf32>
    %259 = vector.broadcast %238 : vector<1x32xf32> to vector<16x32xf32>
    %260 = arith.addf %258, %259 : vector<16x32xf32>
    %c576 = arith.constant 576 : index
    %c0_93 = arith.constant 0 : index
    %261 = vector.load %arg1[%c576, %c0_93] : memref<1120x128xbf16, #tpu.memory_space<vmem>>, vector<32x128xbf16>
    %262 = arith.truncf %260 : vector<16x32xf32> to vector<16x32xbf16>
    %cst_94 = arith.constant dense<0.000000e+00> : vector<16x128xf32>
    %263 = tpu.matmul %262, %261, %cst_94 {dimension_numbers = #tpu.dot_dimension_numbers<[1], [0], [0], [1], [0, 0, 1, 1], [], []>} : vector<16x32xbf16>, vector<32x128xbf16>, vector<16x128xf32> -> vector<16x128xf32>
    %c17 = arith.constant 17 : index
    %c0_95 = arith.constant 0 : index
    %264 = vector.load %arg2[%c17, %c0_95] : memref<40x128xf32, #tpu.memory_space<vmem>>, vector<1x128xf32>
    %265 = vector.broadcast %264 : vector<1x128xf32> to vector<16x128xf32>
    %266 = arith.addf %263, %265 : vector<16x128xf32>
    %cst_96 = arith.constant 5.000000e-01 : f32
    %267 = vector.broadcast %cst_96 : f32 to vector<16x128xf32>
    %268 = arith.mulf %267, %266 : vector<16x128xf32>
    %cst_97 = arith.constant 0.707106769 : f32
    %269 = vector.broadcast %cst_97 : f32 to vector<16x128xf32>
    %270 = arith.mulf %266, %269 : vector<16x128xf32>
    %271 = math.erf %270 : vector<16x128xf32>
    %cst_98 = arith.constant 1.000000e+00 : f32
    %272 = vector.broadcast %cst_98 : f32 to vector<16x128xf32>
    %273 = arith.addf %272, %271 : vector<16x128xf32>
    %274 = arith.mulf %268, %273 : vector<16x128xf32>
    %c608 = arith.constant 608 : index
    %c0_99 = arith.constant 0 : index
    %275 = vector.load %arg1[%c608, %c0_99] : memref<1120x128xbf16, #tpu.memory_space<vmem>>, vector<128x128xbf16>
    %276 = arith.truncf %274 : vector<16x128xf32> to vector<16x128xbf16>
    %cst_100 = arith.constant dense<0.000000e+00> : vector<16x128xf32>
    %277 = tpu.matmul %276, %275, %cst_100 {dimension_numbers = #tpu.dot_dimension_numbers<[1], [0], [0], [1], [0, 0, 1, 1], [], []>} : vector<16x128xbf16>, vector<128x128xbf16>, vector<16x128xf32> -> vector<16x128xf32>
    %278 = vector.extract_strided_slice %277 {offsets = [0, 0], sizes = [16, 32], strides = [1, 1]} : vector<16x128xf32> to vector<16x32xf32>
    %c18 = arith.constant 18 : index
    %c0_101 = arith.constant 0 : index
    %279 = vector.load %arg2[%c18, %c0_101] : memref<40x128xf32, #tpu.memory_space<vmem>>, vector<1x32xf32>
    %280 = vector.broadcast %279 : vector<1x32xf32> to vector<16x32xf32>
    %281 = arith.addf %278, %280 : vector<16x32xf32>
    %282 = arith.addf %260, %281 : vector<16x32xf32>
    %c21 = arith.constant 21 : index
    %c0_102 = arith.constant 0 : index
    %283 = vector.load %arg2[%c21, %c0_102] : memref<40x128xf32, #tpu.memory_space<vmem>>, vector<1x32xf32>
    %c22 = arith.constant 22 : index
    %c0_103 = arith.constant 0 : index
    %284 = vector.load %arg2[%c22, %c0_103] : memref<40x128xf32, #tpu.memory_space<vmem>>, vector<1x32xf32>
    %cst_104 = arith.constant dense<0.000000e+00> : vector<16xf32>
    %285 = vector.multi_reduction <add>, %282, %cst_104 [1] : vector<16x32xf32> to vector<16xf32>
    %286 = vector.shape_cast %285 : vector<16xf32> to vector<16x1xf32>
    %cst_105 = arith.constant 3.200000e+01 : f32
    %287 = vector.broadcast %cst_105 : f32 to vector<16x1xf32>
    %288 = arith.divf %286, %287 : vector<16x1xf32>
    %289 = vector.broadcast %288 : vector<16x1xf32> to vector<16x32xf32>
    %290 = arith.subf %282, %289 : vector<16x32xf32>
    %291 = arith.mulf %290, %290 : vector<16x32xf32>
    %cst_106 = arith.constant dense<0.000000e+00> : vector<16xf32>
    %292 = vector.multi_reduction <add>, %291, %cst_106 [1] : vector<16x32xf32> to vector<16xf32>
    %293 = vector.shape_cast %292 : vector<16xf32> to vector<16x1xf32>
    %cst_107 = arith.constant 3.200000e+01 : f32
    %294 = vector.broadcast %cst_107 : f32 to vector<16x1xf32>
    %295 = arith.divf %293, %294 : vector<16x1xf32>
    %296 = vector.broadcast %288 : vector<16x1xf32> to vector<16x32xf32>
    %297 = arith.subf %282, %296 : vector<16x32xf32>
    %cst_108 = arith.constant 9.99999974E-6 : f32
    %298 = vector.broadcast %cst_108 : f32 to vector<16x1xf32>
    %299 = arith.addf %295, %298 : vector<16x1xf32>
    %300 = math.rsqrt %299 : vector<16x1xf32>
    %301 = vector.broadcast %300 : vector<16x1xf32> to vector<16x32xf32>
    %302 = arith.mulf %297, %301 : vector<16x32xf32>
    %303 = vector.broadcast %283 : vector<1x32xf32> to vector<16x32xf32>
    %304 = arith.mulf %302, %303 : vector<16x32xf32>
    %305 = vector.broadcast %284 : vector<1x32xf32> to vector<16x32xf32>
    %306 = arith.addf %304, %305 : vector<16x32xf32>
    %c0_109 = arith.constant 0 : index
    %c0_110 = arith.constant 0 : index
    %307 = vector.load %arg3[%c0_109, %c0_110] : memref<16x32xf32, #tpu.memory_space<vmem>>, vector<16x32xf32>
    tpu.vector_store %arg3[%c0_109, %c0_110], %306 {strides = array<i32>} : memref<16x32xf32, #tpu.memory_space<vmem>>, vector<16x32xf32>,
    return
  }
}

</mosaic_0001>

<bundles_post_ra>
// kernel: symbolic_expression_parser_forward.1
= control target key start
LH: loop header
LB: loop body
LE: loop exit
PB: predicated region body
PF: predicated region fallthrough
CT: control target
= control target key end

     0   :  { %8 = vsyncpa [#allocation3], 0  ;;  %s3899_s0 = inlined_call_operand.hbm [shape: f32[16,32], index: 0, kind: input, shape index: {}]   ;;  %s3900_s1 = inlined_call_operand.hbm [shape: bf16[1120,128], index: 1, kind: input, shape index: {}]   ;;  %s3901_s2 = inlined_call_operand.hbm [shape: f32[40,128], index: 2, kind: input, shape index: {}]   ;;  %s3902_s3 = inlined_call_operand.hbm [shape: f32[16,32], index: 3, kind: output, shape index: {}]  }
   0x1   :  { %9 = vsyncpa [#allocation6], 0 }
   0x2   :  { %10 = vsyncpa [#allocation4], 0  ;;  %s3400_s12 = smov [#allocation5]   ;;  %s3306_s16 = scalar_lea.hbm %s3900_s1, 8960 }
   0x3   :  { %s28_s13 = sshll.u32 %s3400_s12, 4  ;;  %p3307_p0 = scmp.ne.s32.totalorder %s3900_s1, %s3306_s16  ;;  %s29_s13 = int_to_ptr.vmem [resolvable:$true] %s28_s13 }
   0x4   :  { %p3310_p1 = scmp.lt.u32.totalorder %s3306_s16, %s3900_s1 }
   0x6   :  { %p3312_p2 = pnand %p3310_p1, %p3307_p0 }
   0x8   :  { %3315 = shalt.err (!%p3312_p2)
}
   0x9   :  { %s3316_s21 = scalar_lea.vmem %s29_s13, 8960  ;;  %p3321_p4 = scmp.lt.s32.totalorder %s29_s13, %s29_s13 }
   0xa   :  { %p3317_p3 = scmp.ne.s32.totalorder %s29_s13, %s3316_s21  ;;  %p3322_p5 = scmp.lt.s32.totalorder %s3316_s21, %s3316_s21 }
   0xc   :  { %p3323_p6 = por %p3322_p5, %p3321_p4 }
   0xe   :  { %p3324_p7 = pnand %p3323_p6, %p3317_p3 }
  0x10   :  { %3327 = shalt.err (!%p3324_p7)
}
  0x11   :  { %s3401_s22 = smov 64   ;;  %s3402_s23 = smov 4  }
  0x12   :  { %34 = dma.hbm_to_vmem [thread:$0]  %s3900_s1, 8960, %s29_s13, [#allocation6], %s3401_s22, %s3401_s22, %s3402_s23  }
  0x13   :  { %s3403_s26 = smov [#allocation2]   ;;  %s3328_s30 = scalar_lea.hbm %s3899_s0, 256 }
  0x14   :  { %s16_s27 = sshll.u32 %s3403_s26, 4  ;;  %p3329_p8 = scmp.ne.s32.totalorder %s3899_s0, %s3328_s30  ;;  %s17_s27 = int_to_ptr.vmem [resolvable:$true] %s16_s27 }
  0x15   :  { %p3332_p9 = scmp.lt.u32.totalorder %s3328_s30, %s3899_s0 }
  0x17   :  { %p3334_p10 = pnand %p3332_p9, %p3329_p8 }
  0x19   :  { %3337 = shalt.err (!%p3334_p10)
}
  0x1a   :  { %s3338_s8 = scalar_lea.vmem %s17_s27, 256  ;;  %p3343_p12 = scmp.lt.s32.totalorder %s17_s27, %s17_s27 }
  0x1b   :  { %p3339_p11 = scmp.ne.s32.totalorder %s17_s27, %s3338_s8  ;;  %p3344_p13 = scmp.lt.s32.totalorder %s3338_s8, %s3338_s8 }
  0x1d   :  { %p3345_p0 = por %p3344_p13, %p3343_p12 }
  0x1f   :  { %p3346_p1 = pnand %p3345_p0, %p3339_p11 }
  0x21   :  { %3349 = shalt.err (!%p3346_p1)
}
  0x22   :  { %s3404_s1 = smov 128   ;;  %s3405_s9 = smov 8  }
  0x23   :  { %22 = dma.hbm_to_vmem [thread:$0]  %s3899_s0, 256, %s17_s27, [#allocation3], %s3404_s1, %s3404_s1, %s3405_s9  }
  0x24   :  { %s3406_s12 = smov [#allocation7]   ;;  %s3350_s16 = scalar_lea.hbm %s3901_s2, 640 }
  0x25   :  { %s40_s13 = sshll.u32 %s3406_s12, 4  ;;  %p3351_p2 = scmp.ne.s32.totalorder %s3901_s2, %s3350_s16  ;;  %s41_s13 = int_to_ptr.vmem [resolvable:$true] %s40_s13 }
  0x26   :  { %p3354_p3 = scmp.lt.u32.totalorder %s3350_s16, %s3901_s2 }
  0x28   :  { %p3356_p4 = pnand %p3354_p3, %p3351_p2 }
  0x2a   :  { %3359 = shalt.err (!%p3356_p4)
}
  0x2b   :  { %s3360_s21 = scalar_lea.vmem %s41_s13, 640  ;;  %p3365_p6 = scmp.lt.s32.totalorder %s41_s13, %s41_s13 }
  0x2c   :  { %p3361_p5 = scmp.ne.s32.totalorder %s41_s13, %s3360_s21  ;;  %p3366_p7 = scmp.lt.s32.totalorder %s3360_s21, %s3360_s21 }
  0x2e   :  { %p3367_p8 = por %p3366_p7, %p3365_p6 }
  0x30   :  { %p3368_p9 = pnand %p3367_p8, %p3361_p5 }
  0x32   :  { %3371 = shalt.err (!%p3368_p9)
}
  0x33   :  { %46 = dma.hbm_to_vmem [thread:$0]  %s3901_s2, 640, %s41_s13, [#allocation6], %s3404_s1, %s3404_s1, %s3405_s9  }
  0x34   :  { %3394 = dma.done.wait [#allocation3], 256  }
  0x35   :  { %3395 = vsyncadd [#allocation3], 4294967040 }
  0x36   :  { %3396 = dma.done.wait [#allocation6], 9600  }
  0x37   :  { %3397 = vsyncadd [#allocation6], 4294957696  ;;  %v3407_v0 = vmov 0.0   ;;  %vm3408_vm0 = vmmov 0   ;;  %v3175_v1 = vld [vmem:[#allocation5 + $0x20] sm:$0xff]   ;;  %v3176_v2 = vld [vmem:[#allocation5 + $0x28] sm:$0xff]  }
  0x38   :  { %2814 = vmatprep.subr.bf16.mxu0 %v3407_v0  ;;  %2818 = vmatprep.mubr.msk.bf16.mxu0 %vm3408_vm0, %v3407_v0  ;;  %v3479_v3 = vld [vmem:[#allocation2] sm:$0xff]  ;;  %v3481_v4 = vld [vmem:[#allocation2 + $0x8] sm:$0xff]  ;;  %vm76_vm1 = vcmask 261120   ;;  %vm128_vm2 = vcmask 523264   ;;  %v3177_v25 = vld [vmem:[#allocation5] sm:$0xff]   ;;  %vm370_vm3 = vcmask 23552  }
  0x39   :  { %2850 = vmatprep.subr.bf16.mxu1 %v3407_v0  ;;  %2854 = vmatprep.mubr.msk.bf16.mxu1 %vm3408_vm0, %v3407_v0  ;;  %v63_v5 = vpack.c.bf16 %v3481_v4, %v3479_v3  ;;  %v2524_v6 = vld [vmem:[#allocation7] ss:$0 sm:$0xff]  ;;  %v3178_v26 = vld [vmem:[#allocation5 + $0x8] sm:$0xff]   ;;  %v3180_v28 = vld [vmem:[#allocation5 + $0x18] sm:$0xff]   ;;  %vm708_vm4 = vcmask 130048   ;;  %s3410_s2 = smov [#allocation8]  }
  0x3a   :  { %2815 = vmatpush3.bf16.msra.mxu0 %v3175_v1  ;;  %v3179_v27 = vld [vmem:[#allocation5 + $0x10] sm:$0xff]   ;;  %v3182_v37 = vld [vmem:[#allocation5 + $0x38] sm:$0xff]   ;;  %v3183_v38 = vld [vmem:[#allocation5 + $0x40] sm:$0xff]   ;;  %s2508_s23 = sshll.u32 %s3410_s2, 4  ;;  %s2509_s23 = int_to_ptr.vmem [resolvable:$true] %s2508_s23 }
  0x3b   :  { %2816 = vmatprep.subr.bf16.mxu0 %v3407_v0  ;;  %v3181_v35 = vld [vmem:[#allocation5 + $0x30] sm:$0xff]   ;;  %v3184_v39 = vld [vmem:[#allocation5 + $0x48] sm:$0xff]   ;;  %s3372_s24 = scalar_lea.vmem %s2509_s23, 256  ;;  %p3377_p11 = scmp.lt.s32.totalorder %s2509_s23, %s2509_s23 }
  0x3c   :  { %v2533_v44 = vld [vmem:[#allocation7 + $0x1] ss:$0 sm:$0xff]  ;;  %v2537_v62 = vld [vmem:[#allocation7 + $0x2] ss:$0 sm:$0xff]  ;;  %p3373_p10 = scmp.ne.s32.totalorder %s2509_s23, %s3372_s24  ;;  %p3378_p12 = scmp.lt.s32.totalorder %s3372_s24, %s3372_s24 }
  0x3e   :  { %2817 = vmatpush3.bf16.msra.mxu0 %v3176_v2  ;;  %p3379_p13 = por %p3378_p12, %p3377_p11 }
  0x3f   :  { %2822 = vmatprep.subr.bf16.mxu0 %v3407_v0 }
  0x40   :  { %p3380_p0 = pnand %p3379_p13, %p3373_p10 }
  0x41   :  { %2819 = vmatmul.mubr.msk.bf16.vlgmr.msra.gmra.mrb[0].mxu0 %vm76_vm1, %v63_v5 }
  0x42   :  { %2830 = vmatprep.mubr.msk.bf16.mxu0 %vm3408_vm0, %v3407_v0  ;;  %2823 = vmatpush3.bf16.msra.mxu0 %v3177_v25 }
  0x43   :  { %2824 = vmatprep.subr.bf16.mxu0 %v3407_v0 }
  0x46   :  { %2825 = vmatpush3.bf16.msra.mxu0 %v3178_v26 }
  0x47   :  { %2826 = vmatprep.subr.bf16.mxu0 %v3407_v0 }
  0x4a   :  { %2827 = vmatpush3.bf16.msra.mxu0 %v3179_v27 }
  0x4b   :  { %2828 = vmatprep.subr.bf16.mxu0 %v3407_v0 }
  0x4e   :  { %2829 = vmatpush3.bf16.msra.mxu0 %v3180_v28  ;;  %v3185_v28 = vld [vmem:[#allocation5 + $0x50] sm:$0xff]  }
  0x4f   :  { %2834 = vmatprep.subr.bf16.mxu0 %v3407_v0  ;;  %2851 = vmatpush3.bf16.msra.mxu1 %v3185_v28 }
  0x50   :  { %2852 = vmatprep.subr.bf16.mxu1 %v3407_v0 }
 0x114   :  { %v114_v7 = vpop.f32.mrb[0].mxu0 }
 0x115   :  { %v126_v8 = vadd.f32 %v2524_v6, %v114_v7  ;;  %v2820_v9 = vpop.f32.mrb[1].mxu0 }
 0x116   :  { %v117_v10 = vpop.f32.mrb[2].mxu0 }
 0x117   :  { %v127_v11 = vadd.f32 %v2524_v6, %v117_v10  ;;  %v2821_v12 = vpop.f32.mrb[3].mxu0  ;;  %v129_v13 = vsel %vm128_vm2, %v126_v8, -inf }
 0x118   :  { %130 = vmax.xlane.f32.xlu0 %v129_v13 }
 0x119   :  { %v132_v14 = vsel %vm128_vm2, %v127_v11, -inf }
 0x11c   :  { %133 = vmax.xlane.f32.xlu0 %v132_v14 }
 0x1a5   :  { %v131_v15 = vpop.xlane.xlu0 %130 }
 0x1a6   :  { %v135_v16 = vsub.f32 %v126_v8, %v131_v15 }
 0x1a8   :  { %v137_v17 = vmul.f32 1.442695, %v135_v16 }
 0x1a9   :  { %v134_v18 = vpop.xlane.xlu0 %133 }
 0x1aa   :  { %3245 = vpow2.f32 %v137_v17  ;;  %v136_v19 = vsub.f32 %v127_v11, %v134_v18 }
 0x1ac   :  { %v139_v20 = vmul.f32 1.442695, %v136_v19 }
 0x1ae   :  { %3247 = vpow2.f32 %v139_v20  ;;  %v3409_v20 = vmov 0  }
 0x1af   :  { %3173 = vset.pattern.permute.xlu0 %v3409_v20  ;;  %3174 = vset.pattern.permute.xlu1 %v3409_v20 }
 0x1b4   :  { %v3246_v21 = vpop.eup %3245 }
 0x1b5   :  { %v141_v22 = vsel %vm128_vm2, %v3246_v21, 0.0 }
 0x1b6   :  { %142 = vadd.xlane.f32.xlu1 %v141_v22 }
 0x1b8   :  { %v3248_v23 = vpop.eup %3247 }
 0x1b9   :  { %v144_v24 = vsel %vm128_vm2, %v3248_v23, 0.0 }
 0x1ba   :  { %145 = vadd.xlane.f32.xlu1 %v144_v24 }
 0x243   :  { %v143_v29 = vpop.xlane.xlu1 %142 }
 0x244   :  { %3249 = vrcp.f32 %v143_v29  ;;  %v3186_v29 = vld [vmem:[#allocation5 + $0x60] sm:$0xff]  }
 0x247   :  { %v146_v30 = vpop.xlane.xlu1 %145 }
 0x248   :  { %3251 = vrcp.f32 %v146_v30 }
 0x24e   :  { %v3250_v31 = vpop.eup %3249 }
 0x24f   :  { %v148_v33 = vmul.f32 %v3250_v31, %v3246_v21  ;;  %v3187_v31 = vld [vmem:[#allocation5 + $0x58] sm:$0xff]  }
 0x250   :  { %2853 = vmatpush3.bf16.msra.mxu1 %v3187_v31 }
 0x251   :  { %2866 = vmatprep.subr.bf16.mxu1 %v3407_v0 }
 0x252   :  { %v3252_v32 = vpop.eup %3251 }
 0x253   :  { %v150_v34 = vmul.f32 %v3252_v32, %v3248_v23  ;;  %v3188_v32 = vld [vmem:[#allocation5 + $0x68] sm:$0xff]  }
 0x255   :  { %v159_v36 = vpack.c.bf16 %v150_v34, %v148_v33 }
 0x257   :  { %2831 = vmatmul.mubr.msk.bf16.vlgmr.msra.gmra.mrb[4].mxu0 %vm128_vm2, %v159_v36 }
 0x258   :  { %2835 = vmatpush3.bf16.msra.mxu0 %v3181_v35  ;;  %2838 = vmatprep.mubr.msk.bf16.mxu0 %vm3408_vm0, %v3407_v0 }
 0x259   :  { %2836 = vmatprep.subr.bf16.mxu0 %v3407_v0 }
 0x25c   :  { %2837 = vmatpush3.bf16.msra.mxu0 %v3182_v37 }
 0x25d   :  { %2842 = vmatprep.subr.bf16.mxu0 %v3407_v0 }
 0x25f   :  { %2839 = vmatmul.mubr.msk.bf16.vlgmr.msra.gmra.mrb[8].mxu0 %vm76_vm1, %v63_v5 }
 0x260   :  { %2846 = vmatprep.mubr.msk.bf16.mxu0 %vm3408_vm0, %v3407_v0  ;;  %2843 = vmatpush3.bf16.msra.mxu0 %v3183_v38 }
 0x261   :  { %2844 = vmatprep.subr.bf16.mxu0 %v3407_v0 }
 0x264   :  { %2845 = vmatpush3.bf16.msra.mxu0 %v3184_v39 }
 0x265   :  { %2858 = vmatprep.subr.bf16.mxu0 %v3407_v0 }
 0x32a   :  { %v3508_v40 = vpop.f32.mrb[4].mxu0 }
 0x32b   :  { %v2832_v41 = vpop.f32.mrb[5].mxu0 }
 0x32c   :  { %v3510_v42 = vpop.f32.mrb[6].mxu0 }
 0x32d   :  { %v2833_v43 = vpop.f32.mrb[7].mxu0 }
 0x332   :  { %v278_v45 = vpop.f32.mrb[8].mxu0 }
 0x333   :  { %v290_v46 = vadd.f32 %v2533_v44, %v278_v45  ;;  %v2840_v47 = vpop.f32.mrb[9].mxu0  ;;  %v3189_v45 = vld [vmem:[#allocation5 + $0x70] sm:$0xff]  }
 0x334   :  { %v281_v48 = vpop.f32.mrb[10].mxu0 }
 0x335   :  { %v294_v49 = vmul.f32 0.70710677, %v290_v46  ;;  %v291_v50 = vadd.f32 %v2533_v44, %v281_v48  ;;  %v2841_v51 = vpop.f32.mrb[11].mxu0  ;;  %v292_v56 = vmul.f32 0.5, %v290_v46  ;;  %v2545_v48 = vld [vmem:[#allocation7 + $0x4] ss:$0 sm:$0xff] }
 0x337   :  { %3253 = verf.f32 %v294_v49  ;;  %v295_v52 = vmul.f32 0.70710677, %v291_v50  ;;  %v293_v57 = vmul.f32 0.5, %v291_v50 }
 0x339   :  { %3255 = verf.f32 %v295_v52 }
 0x341   :  { %v3254_v53 = vpop.eup %3253 }
 0x342   :  { %v298_v54 = vadd.f32 1.0, %v3254_v53 }
 0x343   :  { %v3256_v55 = vpop.eup %3255 }
 0x344   :  { %v299_v58 = vadd.f32 1.0, %v3256_v55  ;;  %v300_v59 = vmul.f32 %v298_v54, %v292_v56 }
 0x346   :  { %v301_v60 = vmul.f32 %v299_v58, %v293_v57 }
 0x348   :  { %v306_v61 = vpack.c.bf16 %v301_v60, %v300_v59 }
 0x34a   :  { %2847 = vmatmul.mubr.msk.bf16.vlgmr.msra.gmra.mrb[12].mxu0 %vm76_vm1, %v306_v61  ;;  %v3550_v61 = vld [vmem:[#allocation5 + $0x1f8] sm:$0xff]  }
 0x34b   :  { %2862 = vmatprep.mubr.msk.bf16.mxu0 %vm3408_vm0, %v3407_v0  ;;  %2859 = vmatpush3.bf16.msra.mxu0 %v3186_v29 }
 0x34c   :  { %2860 = vmatprep.subr.bf16.mxu0 %v3407_v0 }
 0x34f   :  { %2861 = vmatpush3.bf16.msra.mxu0 %v3188_v32  ;;  %v3606_v32 = vld [vmem:[#allocation5 + $0x180] sm:$0xff]  }
 0x41d   :  { %v356_v63 = vpop.f32.mrb[12].mxu0 }
 0x41e   :  { %v368_v1 = vadd.f32 %v2537_v62, %v356_v63  ;;  %v2848_v2 = vpop.f32.mrb[13].mxu0  ;;  %v2549_v63 = vld [vmem:[#allocation7 + $0x5] ss:$0 sm:$0xff] }
 0x41f   :  { %v359_v5 = vpop.f32.mrb[14].mxu0 }
 0x420   :  { %v369_v6 = vadd.f32 %v2537_v62, %v359_v5  ;;  %v2849_v7 = vpop.f32.mrb[15].mxu0  ;;  %v371_v8 = vsel %vm370_vm3, %v368_v1, -inf }
 0x421   :  { %372 = vmax.xlane.f32.xlu0 %v371_v8 }
 0x422   :  { %v374_v9 = vsel %vm370_vm3, %v369_v6, -inf }
 0x423   :  { %375 = vmax.xlane.f32.xlu1 %v374_v9 }
 0x4ae   :  { %v373_v10 = vpop.xlane.xlu0 %372 }
 0x4af   :  { %v377_v11 = vsub.f32 %v368_v1, %v373_v10  ;;  %v3552_v1 = vld [vmem:[#allocation5 + $0x200] sm:$0xff]   ;;  %v3559_v10 = vld [vmem:[#allocation5 + $0x208] sm:$0xff]  }
 0x4b0   :  { %v376_v12 = vpop.xlane.xlu1 %375 }
 0x4b1   :  { %v379_v13 = vmul.f32 1.442695, %v377_v11  ;;  %v378_v14 = vsub.f32 %v369_v6, %v376_v12  ;;  %v3561_v11 = vld [vmem:[#allocation5 + $0x210] sm:$0xff]   ;;  %v3572_v12 = vld [vmem:[#allocation5 + $0x218] sm:$0xff]  }
 0x4b3   :  { %3257 = vpow2.f32 %v379_v13  ;;  %v381_v15 = vmul.f32 1.442695, %v378_v14  ;;  %v3574_v13 = vld [vmem:[#allocation5 + $0x220] sm:$0xff]   ;;  %v3584_v14 = vld [vmem:[#allocation5 + $0x228] sm:$0xff]  }
 0x4b5   :  { %3259 = vpow2.f32 %v381_v15 }
 0x4bd   :  { %v3258_v16 = vpop.eup %3257 }
 0x4be   :  { %v383_v17 = vsel %vm370_vm3, %v3258_v16, 0.0 }
 0x4bf   :  { %v3260_v18 = vpop.eup %3259  ;;  %384 = vadd.xlane.f32.xlu0 %v383_v17 }
 0x4c0   :  { %v386_v19 = vsel %vm370_vm3, %v3260_v18, 0.0 }
 0x4c1   :  { %387 = vadd.xlane.f32.xlu1 %v386_v19 }
 0x54c   :  { %v385_v21 = vpop.xlane.xlu0 %384 }
 0x54d   :  { %3261 = vrcp.f32 %v385_v21 }
 0x54e   :  { %v388_v22 = vpop.xlane.xlu1 %387 }
 0x54f   :  { %3263 = vrcp.f32 %v388_v22 }
 0x557   :  { %v3262_v23 = vpop.eup %3261 }
 0x558   :  { %v390_v24 = vmul.f32 %v3262_v23, %v3258_v16  ;;  %v3601_v23 = vld [vmem:[#allocation5 + $0x178] sm:$0xff]  }
 0x559   :  { %v3264_v25 = vpop.eup %3263 }
 0x55a   :  { %395 = vperm.xlu0 %3173, %v390_v24   ;;  %v392_v26 = vmul.f32 %v3264_v25, %v3260_v18  ;;  %v405_v27 = vsub.f32 1.0, %v390_v24  ;;  %v3598_v18 = vld [vmem:[#allocation5 + $0x170] sm:$0xff]  }
 0x55c   :  { %400 = vperm.xlu1 %3174, %v392_v26   ;;  %v406_v30 = vsub.f32 1.0, %v392_v26 }
 0x560   :  { %409 = vperm.xlu1 %3174, %v405_v27  }
 0x564   :  { %414 = vperm.xlu1 %3174, %v406_v30  }
 0x5d9   :  { %v396_v35 = vpop.permute.xlu0 %395 }
 0x5da   :  { %v403_v38 = vmul.f32 %v396_v35, %v3508_v40 }
 0x5db   :  { %v401_v33 = vpop.permute.xlu1 %400 }
 0x5dc   :  { %v404_v39 = vmul.f32 %v401_v33, %v3510_v42  ;;  %v2541_v42 = vld [vmem:[#allocation7 + $0x3] ss:$0 sm:$0xff] }
 0x5df   :  { %v410_v34 = vpop.permute.xlu1 %409 }
 0x5e0   :  { %v417_v36 = vmul.f32 %v410_v34, %v3479_v3  ;;  %v3190_v3 = vld [vmem:[#allocation5 + $0x78] sm:$0xff]  }
 0x5e2   :  { %v3526_v43 = vadd.f32 %v417_v36, %v403_v38 }
 0x5e3   :  { %v415_v37 = vpop.permute.xlu1 %414 }
 0x5e4   :  { %v418_v41 = vmul.f32 %v415_v37, %v3481_v4  ;;  %v3538_v4 = vld [vmem:[#allocation5 + $0x1f0] sm:$0xff]  }
 0x5e6   :  { %v3528_v44 = vadd.f32 %v418_v41, %v404_v39 }
 0x5e8   :  { %v475_v46 = vpack.c.bf16 %v3528_v44, %v3526_v43 }
 0x5ea   :  { %2855 = vmatmul.mubr.msk.bf16.vlgmr.msra.gmra.mrb[0].mxu1 %vm76_vm1, %v475_v46  ;;  %2863 = vmatmul.mubr.msk.bf16.vlgmr.msra.gmra.mrb[16].mxu0 %vm76_vm1, %v475_v46 }
 0x5eb   :  { %2867 = vmatpush3.bf16.msra.mxu1 %v3189_v45  ;;  %2870 = vmatprep.mubr.msk.bf16.mxu1 %vm3408_vm0, %v3407_v0  ;;  %v3611_v45 = vld [vmem:[#allocation5 + $0x188] sm:$0xff]  }
 0x5ec   :  { %2868 = vmatprep.subr.bf16.mxu1 %v3407_v0  ;;  %2876 = vmatprep.mubr.msk.bf16.mxu0 %vm708_vm4, %v3538_v4 }
 0x5ef   :  { %2869 = vmatpush3.bf16.msra.mxu1 %v3190_v3 }
 0x5f2   :  { %2871 = vmatmul.mubr.msk.bf16.vlgmr.msra.gmra.mrb[4].mxu1 %vm76_vm1, %v475_v46 }
 0x5f3   :  { %2894 = vmatprep.mubr.msk.bf16.mxu1 %vm708_vm4, %v3538_v4 }
 0x6bd   :  { %v525_v40 = vpop.f32.mrb[0].mxu1  ;;  %v589_v47 = vpop.f32.mrb[16].mxu0 }
 0x6be   :  { %v2856_v49 = vpop.f32.mrb[1].mxu1  ;;  %v2864_v50 = vpop.f32.mrb[17].mxu0  ;;  %v3544_v53 = vadd.f32 %v2541_v42, %v525_v40  ;;  %v601_v54 = vadd.f32 %v2545_v48, %v589_v47 }
 0x6bf   :  { %v528_v51 = vpop.f32.mrb[2].mxu1  ;;  %v592_v52 = vpop.f32.mrb[18].mxu0 }
 0x6c0   :  { %v3546_v55 = vadd.f32 %v2541_v42, %v528_v51  ;;  %v602_v56 = vadd.f32 %v2545_v48, %v592_v52  ;;  %v2857_v57 = vpop.f32.mrb[3].mxu1  ;;  %v2865_v58 = vpop.f32.mrb[19].mxu0  ;;  %v3616_v51 = vld [vmem:[#allocation5 + $0x190] sm:$0xff]  }
 0x6c2   :  { %v1008_v59 = vpack.c.bf16 %v3546_v55, %v3544_v53  ;;  %v667_v60 = vpack.c.bf16 %v602_v56, %v601_v54  ;;  %v3621_v56 = vld [vmem:[#allocation5 + $0x198] sm:$0xff]   ;;  %v3656_v53 = vld [vmem:[#allocation7 + $0x18] sm:$0xff] }
 0x6c4   :  { %2874 = vmatprep.subr.bf16.mxu0 %v667_v60 }
 0x6c5   :  { %v653_v62 = vpop.f32.mrb[4].mxu1  ;;  %2875 = vmatpush3.bf16.msra.mxu0 %v667_v60  ;;  %v3626_v60 = vld [vmem:[#allocation5 + $0x1a0] sm:$0xff]  }
 0x6c6   :  { %v2872_v2 = vpop.f32.mrb[5].mxu1  ;;  %2910 = vmatprep.subr.bf16.mxu0 %v3407_v0  ;;  %v665_v6 = vadd.f32 %v2549_v63, %v653_v62 }
 0x6c7   :  { %v656_v5 = vpop.f32.mrb[6].mxu1  ;;  %v3631_v2 = vld [vmem:[#allocation5 + $0x1a8] sm:$0xff]  }
 0x6c8   :  { %v666_v7 = vadd.f32 %v2549_v63, %v656_v5  ;;  %v2873_v8 = vpop.f32.mrb[7].mxu1  ;;  %2877 = vmatmul.mubr.msk.bf16.vlgmr.msra.gmra.mrb[20].mxu0 %vm708_vm4, %v3550_v61 }
 0x6c9   :  { %2880 = vmatprep.mubr.msk.bf16.mxu0 %vm708_vm4, %v3552_v1  ;;  %v3644_v8 = vld [vmem:[#allocation5 + $0x1b0] sm:$0xff]  }
 0x6ca   :  { %v894_v9 = vpack.c.bf16 %v666_v7, %v665_v6 }
 0x6cc   :  { %2892 = vmatprep.subr.bf16.mxu1 %v894_v9 }
 0x6cd   :  { %2893 = vmatpush3.bf16.msra.mxu1 %v894_v9  ;;  %v3647_v9 = vld [vmem:[#allocation5 + $0x1b8] sm:$0xff]  }
 0x6ce   :  { %2930 = vmatprep.subr.bf16.mxu1 %v3407_v0 }
 0x6d0   :  { %2881 = vmatmul.mubr.msk.bf16.gmra.mrb[24].mxu0 %vm708_vm4, %v3559_v10  ;;  %2895 = vmatmul.mubr.msk.bf16.vlgmr.msra.gmra.mrb[8].mxu1 %vm708_vm4, %v3550_v61 }
 0x6d1   :  { %2884 = vmatprep.mubr.msk.bf16.mxu0 %vm708_vm4, %v3561_v11  ;;  %2898 = vmatprep.mubr.msk.bf16.mxu1 %vm708_vm4, %v3552_v1 }
 0x6d2   :  { %2931 = vmatpush3.bf16.msra.mxu1 %v3644_v8 }
 0x6d3   :  { %2932 = vmatprep.subr.bf16.mxu1 %v3407_v0 }
 0x6d6   :  { %2933 = vmatpush3.bf16.msra.mxu1 %v3647_v9 }
 0x6d7   :  { %2934 = vmatprep.subr.bf16.mxu1 %v3407_v0 }
 0x6d8   :  { %2885 = vmatmul.mubr.msk.bf16.gmra.mrb[28].mxu0 %vm708_vm4, %v3572_v12  ;;  %2899 = vmatmul.mubr.msk.bf16.gmra.mrb[12].mxu1 %vm708_vm4, %v3559_v10 }
 0x6d9   :  { %2888 = vmatprep.mubr.msk.bf16.mxu0 %vm708_vm4, %v3574_v13  ;;  %2902 = vmatprep.mubr.msk.bf16.mxu1 %vm708_vm4, %v3561_v11 }
 0x6e0   :  { %2889 = vmatmul.mubr.msk.bf16.gmra.mrb[32].mxu0 %vm708_vm4, %v3584_v14  ;;  %2903 = vmatmul.mubr.msk.bf16.gmra.mrb[16].mxu1 %vm708_vm4, %v3572_v12 }
 0x6e1   :  { %2926 = vmatprep.mubr.msk.bf16.mxu0 %vm3408_vm0, %v3407_v0  ;;  %2906 = vmatprep.mubr.msk.bf16.mxu1 %vm708_vm4, %v3574_v13 }
 0x6e8   :  { %2907 = vmatmul.mubr.msk.bf16.gmra.mrb[20].mxu1 %vm708_vm4, %v3584_v14 }
 0x6e9   :  { %2946 = vmatprep.mubr.msk.bf16.mxu1 %vm3408_vm0, %v3407_v0 }
 0x79b   :  { %v2878_v15 = vpop.f32.mrb[20].mxu0 }
 0x79c   :  { %v767_v16 = vpop.f32.mrb[21].mxu0 }
 0x79d   :  { %v2879_v17 = vpop.f32.mrb[22].mxu0 }
 0x79e   :  { %v831_v19 = vpack.c.bf16 %v2879_v17, %v2878_v15  ;;  %v770_v20 = vpop.f32.mrb[23].mxu0  ;;  %v3651_v15 = vld [vmem:[#allocation5 + $0x1c0] sm:$0xff]  }
 0x79f   :  { %v830_v21 = vpack.c.bf16 %v770_v20, %v767_v16  ;;  %2935 = vmatpush3.bf16.msra.mxu1 %v3651_v15 }
 0x7a0   :  { %v887_v30 = vmul.bf16 %v3601_v23, %v831_v19  ;;  %2936 = vmatprep.subr.bf16.mxu1 %v3407_v0 }
 0x7a1   :  { %v886_v22 = vmul.bf16 %v3598_v18, %v830_v21 }
 0x7a2   :  { %v1016_v33 = vsel %vm76_vm1, %v887_v30, 0 }
 0x7a3   :  { %v1013_v24 = vsel %vm76_vm1, %v886_v22, 0  ;;  %v2882_v25 = vpop.f32.mrb[24].mxu0  ;;  %v3662_v22 = vld [vmem:[#allocation5 + $0x1c8] sm:$0xff]  }
 0x7a4   :  { %2911 = vmatpush3.bf16.xpose.msra.mxu0 %v1013_v24  ;;  %v783_v26 = vpop.f32.mrb[25].mxu0  ;;  %2937 = vmatpush3.bf16.msra.mxu1 %v3662_v22  ;;  %v3666_v24 = vld [vmem:[#allocation5 + $0x1d0] sm:$0xff]  }
 0x7a5   :  { %v2883_v27 = vpop.f32.mrb[26].mxu0  ;;  %2912 = vmatprep.subr.bf16.mxu0 %v3407_v0  ;;  %2938 = vmatprep.subr.bf16.mxu1 %v3407_v0 }
 0x7a6   :  { %v833_v28 = vpack.c.bf16 %v2883_v27, %v2882_v25  ;;  %v786_v29 = vpop.f32.mrb[27].mxu0  ;;  %v3670_v25 = vld [vmem:[#allocation5 + $0x1d8] sm:$0xff]   ;;  %v3677_v27 = vld [vmem:[#allocation5 + $0x1e8] sm:$0xff]  }
 0x7a7   :  { %v832_v31 = vpack.c.bf16 %v786_v29, %v783_v26  ;;  %v3673_v26 = vld [vmem:[#allocation5 + $0x1e0] sm:$0xff]  }
 0x7a8   :  { %v889_v49 = vmul.bf16 %v3611_v45, %v833_v28  ;;  %2939 = vmatpush3.bf16.msra.mxu1 %v3666_v24  ;;  %v2896_v28 = vpop.f32.mrb[8].mxu1 }
 0x7a9   :  { %v888_v39 = vmul.bf16 %v3606_v32, %v832_v31  ;;  %2940 = vmatprep.subr.bf16.mxu1 %v3407_v0  ;;  %v929_v29 = vpop.f32.mrb[9].mxu1 }
 0x7aa   :  { %v1022_v52 = vsel %vm76_vm1, %v889_v49, 0  ;;  %v2897_v30 = vpop.f32.mrb[10].mxu1 }
 0x7ab   :  { %v2886_v34 = vpop.f32.mrb[28].mxu0  ;;  %v1019_v46 = vsel %vm76_vm1, %v888_v39, 0  ;;  %v993_v31 = vpack.c.bf16 %v2897_v30, %v2896_v28 }
 0x7ac   :  { %2913 = vmatpush3.bf16.xpose.msra.mxu0 %v1016_v33  ;;  %v799_v35 = vpop.f32.mrb[29].mxu0  ;;  %2941 = vmatpush3.bf16.msra.mxu1 %v3670_v25  ;;  %v932_v33 = vpop.f32.mrb[11].mxu1 }
 0x7ad   :  { %2914 = vmatprep.subr.bf16.mxu0 %v3407_v0  ;;  %v2887_v36 = vpop.f32.mrb[30].mxu0  ;;  %2942 = vmatprep.subr.bf16.mxu1 %v3407_v0 }
 0x7ae   :  { %v835_v37 = vpack.c.bf16 %v2887_v36, %v2886_v34  ;;  %v802_v38 = vpop.f32.mrb[31].mxu0  ;;  %v992_v34 = vpack.c.bf16 %v932_v33, %v929_v29  ;;  %v1001_v29 = vmul.bf16 %v3601_v23, %v993_v31 }
 0x7af   :  { %v834_v41 = vpack.c.bf16 %v802_v38, %v799_v35  ;;  %v2900_v35 = vpop.f32.mrb[12].mxu1 }
 0x7b0   :  { %v891_v58 = vmul.bf16 %v3621_v56, %v835_v37  ;;  %2943 = vmatpush3.bf16.msra.mxu1 %v3673_v26  ;;  %v945_v36 = vpop.f32.mrb[13].mxu1 }
 0x7b1   :  { %v890_v54 = vmul.bf16 %v3616_v51, %v834_v41  ;;  %2944 = vmatprep.subr.bf16.mxu1 %v3407_v0  ;;  %v2901_v37 = vpop.f32.mrb[14].mxu1 }
 0x7b2   :  { %v1028_v62 = vsel %vm76_vm1, %v891_v58, 0  ;;  %v995_v38 = vpack.c.bf16 %v2901_v37, %v2900_v35  ;;  %v948_v39 = vpop.f32.mrb[15].mxu1  ;;  %v3215_v35 = vld [vmem:[#allocation5 + $0x80] sm:$0xff]  }
 0x7b3   :  { %v2890_v3 = vpop.f32.mrb[32].mxu0  ;;  %v1025_v57 = vsel %vm76_vm1, %v890_v54, 0  ;;  %v994_v41 = vpack.c.bf16 %v948_v39, %v945_v36 }
 0x7b4   :  { %2915 = vmatpush3.bf16.xpose.msra.mxu0 %v1019_v46  ;;  %v815_v40 = vpop.f32.mrb[33].mxu0  ;;  %2945 = vmatpush3.bf16.msra.mxu1 %v3677_v27  ;;  %v2904_v46 = vpop.f32.mrb[16].mxu1 }
 0x7b5   :  { %2916 = vmatprep.subr.bf16.mxu0 %v3407_v0  ;;  %v2891_v42 = vpop.f32.mrb[34].mxu0  ;;  %2950 = vmatprep.subr.bf16.mxu1 %v3407_v0 }
 0x7b6   :  { %v837_v47 = vpack.c.bf16 %v2891_v42, %v2890_v3  ;;  %v818_v48 = vpop.f32.mrb[35].mxu0  ;;  %v961_v3 = vpop.f32.mrb[17].mxu1 }
 0x7b7   :  { %v836_v50 = vpack.c.bf16 %v818_v48, %v815_v40  ;;  %v2905_v40 = vpop.f32.mrb[18].mxu1 }
 0x7b8   :  { %v893_v6 = vmul.bf16 %v3631_v2, %v837_v47  ;;  %v997_v42 = vpack.c.bf16 %v2905_v40, %v2904_v46  ;;  %v964_v47 = vpop.f32.mrb[19].mxu1 }
 0x7b9   :  { %v892_v63 = vmul.bf16 %v3626_v60, %v836_v50  ;;  %v996_v48 = vpack.c.bf16 %v964_v47, %v961_v3 }
 0x7ba   :  { %v1034_v7 = vsel %vm76_vm1, %v893_v6, 0  ;;  %v1005_v31 = vmul.bf16 %v3621_v56, %v997_v42 }
 0x7bb   :  { %v1031_v5 = vsel %vm76_vm1, %v892_v63, 0  ;;  %v2908_v49 = vpop.f32.mrb[20].mxu1  ;;  %v1004_v30 = vmul.bf16 %v3616_v51, %v996_v48 }
 0x7bc   :  { %2917 = vmatpush3.bf16.xpose.msra.mxu0 %v1022_v52  ;;  %v977_v50 = vpop.f32.mrb[21].mxu1 }
 0x7bd   :  { %2918 = vmatprep.subr.bf16.mxu0 %v3407_v0  ;;  %v2909_v52 = vpop.f32.mrb[22].mxu1 }
 0x7be   :  { %v999_v54 = vpack.c.bf16 %v2909_v52, %v2908_v49  ;;  %v3216_v49 = vld [vmem:[#allocation5 + $0x88] sm:$0xff]  }
 0x7c4   :  { %2919 = vmatpush3.bf16.xpose.msra.mxu0 %v1025_v57  ;;  %v980_v57 = vpop.f32.mrb[23].mxu1 }
 0x7c5   :  { %2920 = vmatprep.subr.bf16.mxu0 %v3407_v0  ;;  %v998_v58 = vpack.c.bf16 %v980_v57, %v977_v50 }
 0x7c7   :  { %v1006_v33 = vmul.bf16 %v3626_v60, %v998_v58 }
 0x7cc   :  { %2921 = vmatpush3.bf16.xpose.msra.mxu0 %v1028_v62 }
 0x7cd   :  { %2922 = vmatprep.subr.bf16.mxu0 %v3407_v0 }
 0x7d4   :  { %2923 = vmatpush3.bf16.xpose.msra.mxu0 %v1031_v5 }
 0x7d5   :  { %2924 = vmatprep.subr.bf16.mxu0 %v3407_v0 }
 0x7dc   :  { %2925 = vmatpush3.bf16.xpose.msra.mxu0 %v1034_v7 }
 0x7dd   :  { %2970 = vmatprep.subr.bf16.mxu0 %v3407_v0 }
 0x7e3   :  { %2927 = vmatmul.mubr.msk.bf16.vlgmr.msra.gmra.mrb[36].mxu0 %vm76_vm1, %v1008_v59  ;;  %v3658_v59 = vld [vmem:[#allocation7 + $0x20] sm:$0xff] }
 0x7e4   :  { %2974 = vmatprep.mubr.msk.bf16.mxu0 %vm3408_vm0, %v3407_v0  ;;  %2971 = vmatpush3.bf16.msra.mxu0 %v3215_v35 }
 0x7e5   :  { %2972 = vmatprep.subr.bf16.mxu0 %v3407_v0 }
 0x7e8   :  { %2973 = vmatpush3.bf16.msra.mxu0 %v3216_v49 }
 0x7e9   :  { %2986 = vmatprep.subr.bf16.mxu0 %v3407_v0 }
 0x8b6   :  { %v1070_v55 = vpop.f32.mrb[36].mxu0 }
 0x8b7   :  { %v1071_v16 = vadd.f32 %v1070_v55, %v3656_v53  ;;  %v2928_v17 = vpop.f32.mrb[37].mxu0 }
 0x8b8   :  { %v1073_v19 = vpop.f32.mrb[38].mxu0 }
 0x8b9   :  { %v1074_v20 = vadd.f32 %v1073_v19, %v3658_v59  ;;  %1077 = vmax.xlane.f32.xlu1 %v1071_v16  ;;  %v2929_v21 = vpop.f32.mrb[39].mxu0 }
 0x8ba   :  { %v1000_v21 = vmul.bf16 %v3598_v18, %v992_v34  ;;  %v1007_v34 = vmul.bf16 %v3631_v2, %v999_v54 }
 0x8bb   :  { %1079 = vmax.xlane.f32.xlu0 %v1074_v20 }
 0x946   :  { %v1078_v62 = vpop.xlane.xlu1 %1077 }
 0x947   :  { %v1081_v63 = vsub.f32 %v1071_v16, %v1078_v62  ;;  %v1002_v16 = vmul.bf16 %v3606_v32, %v994_v41  ;;  %v2594_v62 = vld [vmem:[#allocation7 + $0x6] ss:$0 sm:$0xff] }
 0x948   :  { %v1080_v5 = vpop.xlane.xlu0 %1079 }
 0x949   :  { %v1083_v6 = vmul.f32 1.442695, %v1081_v63  ;;  %v1082_v7 = vsub.f32 %v1074_v20, %v1080_v5  ;;  %v1003_v20 = vmul.bf16 %v3611_v45, %v995_v38 }
 0x94b   :  { %v1085_v55 = vmul.f32 1.442695, %v1082_v7  ;;  %3265 = vpow2.f32 %v1083_v6 }
 0x94d   :  { %3267 = vpow2.f32 %v1085_v55 }
 0x955   :  { %v3266_v17 = vpop.eup %3265 }
 0x957   :  { %v3268_v19 = vpop.eup %3267 }
 0x958   :  { %v1087_v28 = vpack.c.bf16 %v3268_v19, %v3266_v17 }
 0x95a   :  { %2947 = vmatmul.mubr.bf16.vlgmr.msra.gmra.mrb[24].mxu1 %v1087_v28 }
 0x95b   :  { %2951 = vmatpush3.bf16.msra.mxu1 %v1000_v21  ;;  %2966 = vmatprep.mubr.msk.bf16.mxu1 %vm3408_vm0, %v3407_v0 }
 0x95c   :  { %2952 = vmatprep.subr.bf16.mxu1 %v3407_v0 }
 0x95f   :  { %2953 = vmatpush3.bf16.msra.mxu1 %v1001_v29 }
 0x960   :  { %2954 = vmatprep.subr.bf16.mxu1 %v3407_v0 }
 0x963   :  { %2955 = vmatpush3.bf16.msra.mxu1 %v1002_v16 }
 0x964   :  { %2956 = vmatprep.subr.bf16.mxu1 %v3407_v0 }
 0x967   :  { %2957 = vmatpush3.bf16.msra.mxu1 %v1003_v20 }
 0x968   :  { %2958 = vmatprep.subr.bf16.mxu1 %v3407_v0 }
 0x96b   :  { %2959 = vmatpush3.bf16.msra.mxu1 %v1004_v30 }
 0x96c   :  { %2960 = vmatprep.subr.bf16.mxu1 %v3407_v0 }
 0x96f   :  { %2961 = vmatpush3.bf16.msra.mxu1 %v1005_v31 }
 0x970   :  { %2962 = vmatprep.subr.bf16.mxu1 %v3407_v0 }
 0x973   :  { %2963 = vmatpush3.bf16.msra.mxu1 %v1006_v33 }
 0x974   :  { %2964 = vmatprep.subr.bf16.mxu1 %v3407_v0 }
 0x977   :  { %2965 = vmatpush3.bf16.msra.mxu1 %v1007_v34 }
 0x978   :  { %2978 = vmatprep.subr.bf16.mxu1 %v3407_v0 }
 0xa2d   :  { %v1170_v36 = vpop.f32.mrb[24].mxu1 }
 0xa2e   :  { %v1177_v37 = vmax.f32 %v1170_v36, 1e-30  ;;  %v2948_v38 = vpop.f32.mrb[25].mxu1 }
 0xa2f   :  { %v1173_v39 = vpop.f32.mrb[26].mxu1  ;;  %v3217_v38 = vld [vmem:[#allocation5 + $0x90] sm:$0xff]  }
 0xa30   :  { %3269 = vrcp.f32 %v1177_v37  ;;  %v1178_v41 = vmax.f32 %v1173_v39, 1e-30  ;;  %v2949_v46 = vpop.f32.mrb[27].mxu1  ;;  %v3219_v39 = vld [vmem:[#allocation5 + $0xa0] sm:$0xff]  }
 0xa32   :  { %3271 = vrcp.f32 %v1178_v41  ;;  %v3220_v41 = vld [vmem:[#allocation5 + $0xa8] sm:$0xff]  }
 0xa3a   :  { %v3270_v3 = vpop.eup %3269 }
 0xa3b   :  { %v1180_v42 = vmul.f32 %v3270_v3, %v3266_v17 }
 0xa3c   :  { %v3272_v40 = vpop.eup %3271 }
 0xa3d   :  { %v1182_v47 = vmul.f32 %v3272_v40, %v3268_v19 }
 0xa3f   :  { %v1183_v48 = vpack.c.bf16 %v1182_v47, %v1180_v42 }
 0xa41   :  { %2967 = vmatmul.mubr.bf16.vlgmr.msra.gmra.mrb[28].mxu1 %v1183_v48 }
 0xa42   :  { %2982 = vmatprep.mubr.msk.bf16.mxu1 %vm3408_vm0, %v3407_v0  ;;  %2979 = vmatpush3.bf16.msra.mxu1 %v3217_v38 }
 0xa43   :  { %2980 = vmatprep.subr.bf16.mxu1 %v3407_v0 }
 0xb14   :  { %v1218_v50 = vpop.f32.mrb[28].mxu1 }
 0xb15   :  { %v2968_v52 = vpop.f32.mrb[29].mxu1 }
 0xb16   :  { %v1221_v54 = vpop.f32.mrb[30].mxu1  ;;  %v2595_v52 = vld [vmem:[#allocation7 + $0x9] ss:$0 sm:$0xff] }
 0xb17   :  { %v1229_v57 = vpack.c.bf16 %v1221_v54, %v1218_v50  ;;  %v2969_v58 = vpop.f32.mrb[31].mxu1 }
 0xb19   :  { %2975 = vmatmul.mubr.msk.bf16.vlgmr.msra.gmra.mrb[40].mxu0 %vm76_vm1, %v1229_v57 }
 0xb1a   :  { %3002 = vmatprep.mubr.msk.bf16.mxu0 %vm3408_vm0, %v3407_v0  ;;  %2987 = vmatpush3.bf16.msra.mxu0 %v3219_v39 }
 0xb1b   :  { %2988 = vmatprep.subr.bf16.mxu0 %v3407_v0 }
 0xb1e   :  { %2989 = vmatpush3.bf16.msra.mxu0 %v3220_v41 }
 0xb1f   :  { %2990 = vmatprep.subr.bf16.mxu0 %v3407_v0 }
 0xbec   :  { %v1279_v63 = vpop.f32.mrb[40].mxu0 }
 0xbed   :  { %v1291_v5 = vadd.f32 %v2594_v62, %v1279_v63  ;;  %v2976_v6 = vpop.f32.mrb[41].mxu0 }
 0xbee   :  { %v1282_v7 = vpop.f32.mrb[42].mxu0 }
 0xbef   :  { %v1292_v55 = vadd.f32 %v2594_v62, %v1282_v7  ;;  %v2977_v17 = vpop.f32.mrb[43].mxu0  ;;  %v1293_v19 = vadd.f32 %v1291_v5, %v3526_v43  ;;  %v2596_v62 = vld [vmem:[#allocation7 + $0xa] ss:$0 sm:$0xff] }
 0xbf0   :  { %v3222_v17 = vld [vmem:[#allocation5 + $0xb8] sm:$0xff]  }
 0xbf1   :  { %v1297_v21 = vsel %vm76_vm1, %v1293_v19, 0.0  ;;  %v1294_v28 = vadd.f32 %v1292_v55, %v3528_v44  ;;  %v3218_v44 = vld [vmem:[#allocation5 + $0x98] sm:$0xff]   ;;  %v3221_v55 = vld [vmem:[#allocation5 + $0xb0] sm:$0xff]  }
 0xbf2   :  { %1298 = vadd.xlane.f32.xlu1 %v1297_v21  ;;  %2981 = vmatpush3.bf16.msra.mxu1 %v3218_v44  ;;  %v3224_v21 = vld [vmem:[#allocation5 + $0xc8] sm:$0xff]  }
 0xbf3   :  { %v1300_v29 = vsel %vm76_vm1, %v1294_v28, 0.0  ;;  %3006 = vmatprep.subr.bf16.mxu1 %v3407_v0  ;;  %2991 = vmatpush3.bf16.msra.mxu0 %v3221_v55 }
 0xbf4   :  { %2992 = vmatprep.subr.bf16.mxu0 %v3407_v0 }
 0xbf6   :  { %1301 = vadd.xlane.f32.xlu1 %v1300_v29  ;;  %v3226_v29 = vld [vmem:[#allocation5 + $0xd8] sm:$0xff]  }
 0xbf7   :  { %2993 = vmatpush3.bf16.msra.mxu0 %v3222_v17 }
 0xbf8   :  { %2994 = vmatprep.subr.bf16.mxu0 %v3407_v0 }
 0xc7f   :  { %v1299_v16 = vpop.xlane.xlu1 %1298 }
 0xc80   :  { %v1304_v20 = vmul.f32 0.03125, %v1299_v16  ;;  %v2597_v16 = vld [vmem:[#allocation7 + $0x7] ss:$0 sm:$0xff] }
 0xc82   :  { %v1306_v30 = vsub.f32 %v1293_v19, %v1304_v20  ;;  %v3223_v19 = vld [vmem:[#allocation5 + $0xc0] sm:$0xff]  }
 0xc83   :  { %v1302_v31 = vpop.xlane.xlu1 %1301  ;;  %2995 = vmatpush3.bf16.msra.mxu0 %v3223_v19 }
 0xc84   :  { %v1305_v33 = vmul.f32 0.03125, %v1302_v31  ;;  %v1308_v34 = vmul.f32 %v1306_v30, %v1306_v30  ;;  %2996 = vmatprep.subr.bf16.mxu0 %v3407_v0 }
 0xc86   :  { %v1307_v35 = vsub.f32 %v1294_v28, %v1305_v33  ;;  %v1310_v36 = vsel %vm76_vm1, %v1308_v34, 0.0  ;;  %v3225_v28 = vld [vmem:[#allocation5 + $0xd0] sm:$0xff]  }
 0xc87   :  { %1311 = vadd.xlane.f32.xlu1 %v1310_v36  ;;  %2997 = vmatpush3.bf16.msra.mxu0 %v3224_v21 }
 0xc88   :  { %v1309_v37 = vmul.f32 %v1307_v35, %v1307_v35  ;;  %2998 = vmatprep.subr.bf16.mxu0 %v3407_v0 }
 0xc8a   :  { %v1313_v43 = vsel %vm76_vm1, %v1309_v37, 0.0 }
 0xc8b   :  { %1314 = vadd.xlane.f32.xlu1 %v1313_v43  ;;  %2999 = vmatpush3.bf16.msra.mxu0 %v3225_v28 }
 0xc8c   :  { %3000 = vmatprep.subr.bf16.mxu0 %v3407_v0 }
 0xc8f   :  { %3001 = vmatpush3.bf16.msra.mxu0 %v3226_v29 }
 0xd14   :  { %v1312_v46 = vpop.xlane.xlu1 %1311 }
 0xd15   :  { %v1316_v3 = vmul.f32 0.03125, %v1312_v46 }
 0xd17   :  { %v1318_v40 = vadd.f32 1e-05, %v1316_v3 }
 0xd18   :  { %v1315_v42 = vpop.xlane.xlu1 %1314 }
 0xd19   :  { %3273 = vrsqrt.f32 %v1318_v40  ;;  %v1317_v47 = vmul.f32 0.03125, %v1315_v42 }
 0xd1b   :  { %v1319_v48 = vadd.f32 1e-05, %v1317_v47  ;;  %v2609_v47 = vld [vmem:[#allocation7 + $0x8] ss:$0 sm:$0xff] }
 0xd1d   :  { %3275 = vrsqrt.f32 %v1319_v48 }
 0xd23   :  { %v3274_v49 = vpop.eup %3273 }
 0xd24   :  { %v1322_v50 = vmul.f32 %v3274_v49, %v1306_v30 }
 0xd26   :  { %v1328_v57 = vmul.f32 %v2595_v52, %v1322_v50 }
 0xd27   :  { %v3276_v54 = vpop.eup %3275 }
 0xd28   :  { %v1323_v58 = vmul.f32 %v3276_v54, %v1307_v35  ;;  %v1334_v5 = vadd.f32 %v2596_v62, %v1328_v57 }
 0xd2a   :  { %v1329_v63 = vmul.f32 %v2595_v52, %v1323_v58 }
 0xd2c   :  { %v1335_v6 = vadd.f32 %v2596_v62, %v1329_v63 }
 0xd2e   :  { %v1340_v7 = vpack.c.bf16 %v1335_v6, %v1334_v5 }
 0xd30   :  { %2983 = vmatmul.mubr.msk.bf16.vlgmr.msra.gmra.mrb[32].mxu1 %vm76_vm1, %v1340_v7 }
 0xd31   :  { %3010 = vmatprep.mubr.msk.bf16.mxu1 %vm3408_vm0, %v3407_v0 }
 0xe03   :  { %v1395_v20 = vpop.f32.mrb[32].mxu1 }
 0xe04   :  { %v1396_v30 = vadd.f32 %v2597_v16, %v1395_v20  ;;  %v2984_v31 = vpop.f32.mrb[33].mxu1 }
 0xe05   :  { %v1398_v33 = vpop.f32.mrb[34].mxu1  ;;  %v3227_v31 = vld [vmem:[#allocation5 + $0xe0] sm:$0xff]  }
 0xe06   :  { %v1404_v34 = vmul.f32 0.70710677, %v1396_v30  ;;  %v1399_v35 = vadd.f32 %v2597_v16, %v1398_v33  ;;  %v2985_v36 = vpop.f32.mrb[35].mxu1  ;;  %v1402_v39 = vmul.f32 0.5, %v1396_v30  ;;  %3007 = vmatpush3.bf16.msra.mxu1 %v3227_v31 }
 0xe07   :  { %3008 = vmatprep.subr.bf16.mxu1 %v3407_v0 }
 0xe08   :  { %3277 = verf.f32 %v1404_v34  ;;  %v1405_v37 = vmul.f32 0.70710677, %v1399_v35  ;;  %v1403_v41 = vmul.f32 0.5, %v1399_v35 }
 0xe0a   :  { %3279 = verf.f32 %v1405_v37 }
 0xe12   :  { %v3278_v43 = vpop.eup %3277 }
 0xe13   :  { %v1408_v38 = vadd.f32 1.0, %v3278_v43 }
 0xe14   :  { %v3280_v44 = vpop.eup %3279 }
 0xe15   :  { %v1409_v46 = vadd.f32 1.0, %v3280_v44  ;;  %v1410_v3 = vmul.f32 %v1408_v38, %v1402_v39  ;;  %v2610_v44 = vld [vmem:[#allocation7 + $0xb] ss:$0 sm:$0xff] }
 0xe17   :  { %v1411_v40 = vmul.f32 %v1409_v46, %v1403_v41 }
 0xe19   :  { %v1428_v42 = vpack.c.bf16 %v1411_v40, %v1410_v3  ;;  %v2611_v40 = vld [vmem:[#allocation7 + $0xc] ss:$0 sm:$0xff] }
 0xe1b   :  { %3003 = vmatmul.mubr.bf16.vlgmr.msra.gmra.mrb[44].mxu0 %v1428_v42 }
 0xe1c   :  { %3050 = vmatprep.mubr.msk.bf16.mxu0 %vm708_vm4, %v3538_v4 }
 0xeee   :  { %v1511_v48 = vpop.f32.mrb[44].mxu0 }
 0xeef   :  { %v1523_v49 = vadd.f32 %v2609_v47, %v1511_v48  ;;  %v3004_v50 = vpop.f32.mrb[45].mxu0 }
 0xef0   :  { %v1514_v52 = vpop.f32.mrb[46].mxu0 }
 0xef1   :  { %v1524_v54 = vadd.f32 %v2609_v47, %v1514_v52  ;;  %v3005_v57 = vpop.f32.mrb[47].mxu0  ;;  %v1525_v58 = vadd.f32 %v1523_v49, %v1334_v5  ;;  %v3229_v49 = vld [vmem:[#allocation5 + $0xf0] sm:$0xff]   ;;  %v3230_v52 = vld [vmem:[#allocation5 + $0xf8] sm:$0xff]  }
 0xef2   :  { %v3232_v57 = vld [vmem:[#allocation5 + $0x108] sm:$0xff]  }
 0xef3   :  { %v1529_v62 = vsel %vm76_vm1, %v1525_v58, 0.0  ;;  %v1526_v63 = vadd.f32 %v1524_v54, %v1335_v6  ;;  %v3228_v6 = vld [vmem:[#allocation5 + $0xe8] sm:$0xff]   ;;  %v3231_v54 = vld [vmem:[#allocation5 + $0x100] sm:$0xff]  }
 0xef4   :  { %1530 = vadd.xlane.f32.xlu0 %v1529_v62  ;;  %3009 = vmatpush3.bf16.msra.mxu1 %v3228_v6  ;;  %v2615_v62 = vld [vmem:[#allocation7 + $0xd] ss:$0 sm:$0xff] }
 0xef5   :  { %v1532_v7 = vsel %vm76_vm1, %v1526_v63, 0.0  ;;  %3014 = vmatprep.subr.bf16.mxu1 %v3407_v0 }
 0xef6   :  { %1533 = vadd.xlane.f32.xlu1 %v1532_v7 }
 0xf81   :  { %v1531_v55 = vpop.xlane.xlu0 %1530 }
 0xf82   :  { %v1535_v17 = vmul.f32 0.03125, %v1531_v55 }
 0xf83   :  { %v1534_v19 = vpop.xlane.xlu1 %1533 }
 0xf84   :  { %v1537_v21 = vsub.f32 %v1525_v58, %v1535_v17  ;;  %v1536_v28 = vmul.f32 0.03125, %v1534_v19 }
 0xf86   :  { %v1538_v29 = vsub.f32 %v1526_v63, %v1536_v28  ;;  %v1539_v16 = vmul.f32 %v1537_v21, %v1537_v21 }
 0xf88   :  { %v1541_v20 = vsel %vm76_vm1, %v1539_v16, 0.0  ;;  %v1540_v30 = vmul.f32 %v1538_v29, %v1538_v29 }
 0xf89   :  { %1542 = vadd.xlane.f32.xlu0 %v1541_v20 }
 0xf8a   :  { %v1544_v5 = vsel %vm76_vm1, %v1540_v30, 0.0 }
 0xf8b   :  { %1545 = vadd.xlane.f32.xlu1 %v1544_v5 }
0x1016   :  { %v1543_v33 = vpop.xlane.xlu0 %1542 }
0x1017   :  { %v1547_v34 = vmul.f32 0.03125, %v1543_v33  ;;  %v2623_v33 = vld [vmem:[#allocation7 + $0xf] ss:$0 sm:$0xff] }
0x1018   :  { %v1546_v35 = vpop.xlane.xlu1 %1545 }
0x1019   :  { %v1549_v36 = vadd.f32 1e-05, %v1547_v34  ;;  %v1548_v37 = vmul.f32 0.03125, %v1546_v35 }
0x101b   :  { %3281 = vrsqrt.f32 %v1549_v36  ;;  %v1550_v43 = vadd.f32 1e-05, %v1548_v37 }
0x101d   :  { %3283 = vrsqrt.f32 %v1550_v43 }
0x1025   :  { %v3282_v38 = vpop.eup %3281 }
0x1026   :  { %v1553_v39 = vmul.f32 %v3282_v38, %v1537_v21 }
0x1027   :  { %v3284_v41 = vpop.eup %3283 }
0x1028   :  { %v1559_v46 = vmul.f32 %v2610_v44, %v1553_v39  ;;  %v1554_v3 = vmul.f32 %v3284_v41, %v1538_v29  ;;  %v2619_v29 = vld [vmem:[#allocation7 + $0xe] ss:$0 sm:$0xff] }
0x102a   :  { %v1560_v42 = vmul.f32 %v2610_v44, %v1554_v3  ;;  %v3733_v47 = vadd.f32 %v2611_v40, %v1559_v46 }
0x102c   :  { %v3735_v48 = vadd.f32 %v2611_v40, %v1560_v42 }
0x102e   :  { %v1571_v50 = vpack.c.bf16 %v3735_v48, %v3733_v47 }
0x1030   :  { %3011 = vmatmul.mubr.msk.bf16.vlgmr.msra.gmra.mrb[36].mxu1 %vm76_vm1, %v1571_v50 }
0x1031   :  { %3015 = vmatpush3.bf16.msra.mxu1 %v3229_v49  ;;  %3018 = vmatprep.mubr.msk.bf16.mxu1 %vm3408_vm0, %v3407_v0 }
0x1032   :  { %3016 = vmatprep.subr.bf16.mxu1 %v3407_v0 }
0x1035   :  { %3017 = vmatpush3.bf16.msra.mxu1 %v3230_v52 }
0x1036   :  { %3022 = vmatprep.subr.bf16.mxu1 %v3407_v0 }
0x1038   :  { %3019 = vmatmul.mubr.msk.bf16.vlgmr.msra.gmra.mrb[40].mxu1 %vm76_vm1, %v1571_v50 }
0x1039   :  { %3023 = vmatpush3.bf16.msra.mxu1 %v3231_v54  ;;  %3026 = vmatprep.mubr.msk.bf16.mxu1 %vm3408_vm0, %v3407_v0 }
0x103a   :  { %3024 = vmatprep.subr.bf16.mxu1 %v3407_v0 }
0x103d   :  { %3025 = vmatpush3.bf16.msra.mxu1 %v3232_v57 }
0x1040   :  { %3027 = vmatmul.mubr.msk.bf16.vlgmr.msra.gmra.mrb[44].mxu1 %vm76_vm1, %v1571_v50 }
0x1041   :  { %3032 = vmatprep.mubr.msk.bf16.mxu1 %vm708_vm4, %v3538_v4 }
0x1103   :  { %v1621_v58 = vpop.f32.mrb[36].mxu1 }
0x1104   :  { %v3012_v63 = vpop.f32.mrb[37].mxu1  ;;  %v3751_v55 = vadd.f32 %v2615_v62, %v1621_v58 }
0x1105   :  { %v1624_v7 = vpop.f32.mrb[38].mxu1 }
0x1106   :  { %v3753_v17 = vadd.f32 %v2615_v62, %v1624_v7  ;;  %v3013_v19 = vpop.f32.mrb[39].mxu1 }
0x1108   :  { %v1991_v21 = vpack.c.bf16 %v3753_v17, %v3751_v55 }
0x110b   :  { %v1685_v28 = vpop.f32.mrb[40].mxu1 }
0x110c   :  { %v3020_v16 = vpop.f32.mrb[41].mxu1  ;;  %v1697_v30 = vadd.f32 %v2619_v29, %v1685_v28 }
0x110d   :  { %v1688_v20 = vpop.f32.mrb[42].mxu1 }
0x110e   :  { %v1698_v5 = vadd.f32 %v2619_v29, %v1688_v20  ;;  %v3021_v31 = vpop.f32.mrb[43].mxu1 }
0x1110   :  { %v1763_v4 = vpack.c.bf16 %v1698_v5, %v1697_v30 }
0x1112   :  { %3030 = vmatprep.subr.bf16.mxu1 %v1763_v4 }
0x1113   :  { %v1749_v6 = vpop.f32.mrb[44].mxu1  ;;  %3031 = vmatpush3.bf16.msra.mxu1 %v1763_v4 }
0x1114   :  { %v3028_v34 = vpop.f32.mrb[45].mxu1  ;;  %3066 = vmatprep.subr.bf16.mxu1 %v3407_v0  ;;  %v1761_v36 = vadd.f32 %v2623_v33, %v1749_v6 }
0x1115   :  { %v1752_v35 = vpop.f32.mrb[46].mxu1 }
0x1116   :  { %v1762_v37 = vadd.f32 %v2623_v33, %v1752_v35  ;;  %v3029_v43 = vpop.f32.mrb[47].mxu1  ;;  %3033 = vmatmul.mubr.msk.bf16.vlgmr.msra.gmra.mrb[48].mxu1 %vm708_vm4, %v3550_v61 }
0x1117   :  { %3036 = vmatprep.mubr.msk.bf16.mxu1 %vm708_vm4, %v3552_v1 }
0x1118   :  { %v1877_v38 = vpack.c.bf16 %v1762_v37, %v1761_v36 }
0x111a   :  { %3048 = vmatprep.subr.bf16.mxu0 %v1877_v38 }
0x111b   :  { %3049 = vmatpush3.bf16.msra.mxu0 %v1877_v38 }
0x111c   :  { %3086 = vmatprep.subr.bf16.mxu0 %v3407_v0 }
0x111e   :  { %3037 = vmatmul.mubr.msk.bf16.gmra.mrb[52].mxu1 %vm708_vm4, %v3559_v10  ;;  %3051 = vmatmul.mubr.msk.bf16.vlgmr.msra.gmra.mrb[48].mxu0 %vm708_vm4, %v3550_v61 }
0x111f   :  { %3040 = vmatprep.mubr.msk.bf16.mxu1 %vm708_vm4, %v3561_v11  ;;  %3087 = vmatpush3.bf16.msra.mxu0 %v3644_v8 }
0x1120   :  { %3088 = vmatprep.subr.bf16.mxu0 %v3407_v0  ;;  %3054 = vmatprep.mubr.msk.bf16.mxu0 %vm708_vm4, %v3552_v1 }
0x1123   :  { %3089 = vmatpush3.bf16.msra.mxu0 %v3647_v9 }
0x1124   :  { %3090 = vmatprep.subr.bf16.mxu0 %v3407_v0 }
0x1126   :  { %3041 = vmatmul.mubr.msk.bf16.gmra.mrb[56].mxu1 %vm708_vm4, %v3572_v12  ;;  %3055 = vmatmul.mubr.msk.bf16.gmra.mrb[52].mxu0 %vm708_vm4, %v3559_v10 }
0x1127   :  { %3044 = vmatprep.mubr.msk.bf16.mxu1 %vm708_vm4, %v3574_v13  ;;  %3091 = vmatpush3.bf16.msra.mxu0 %v3651_v15 }
0x1128   :  { %3092 = vmatprep.subr.bf16.mxu0 %v3407_v0  ;;  %3058 = vmatprep.mubr.msk.bf16.mxu0 %vm708_vm4, %v3561_v11 }
0x112b   :  { %3093 = vmatpush3.bf16.msra.mxu0 %v3662_v22 }
0x112c   :  { %3094 = vmatprep.subr.bf16.mxu0 %v3407_v0 }
0x112e   :  { %3045 = vmatmul.mubr.msk.bf16.gmra.mrb[60].mxu1 %vm708_vm4, %v3584_v14  ;;  %3059 = vmatmul.mubr.msk.bf16.gmra.mrb[56].mxu0 %vm708_vm4, %v3572_v12 }
0x112f   :  { %3082 = vmatprep.mubr.msk.bf16.mxu1 %vm3408_vm0, %v3407_v0  ;;  %3095 = vmatpush3.bf16.msra.mxu0 %v3666_v24 }
0x1130   :  { %3096 = vmatprep.subr.bf16.mxu0 %v3407_v0  ;;  %3062 = vmatprep.mubr.msk.bf16.mxu0 %vm708_vm4, %v3574_v13 }
0x1133   :  { %3097 = vmatpush3.bf16.msra.mxu0 %v3670_v25 }
0x1134   :  { %3098 = vmatprep.subr.bf16.mxu0 %v3407_v0 }
0x1136   :  { %3063 = vmatmul.mubr.msk.bf16.gmra.mrb[60].mxu0 %vm708_vm4, %v3584_v14 }
0x1137   :  { %3099 = vmatpush3.bf16.msra.mxu0 %v3673_v26  ;;  %3102 = vmatprep.mubr.msk.bf16.mxu0 %vm3408_vm0, %v3407_v0 }
0x1138   :  { %3100 = vmatprep.subr.bf16.mxu0 %v3407_v0 }
0x113b   :  { %3101 = vmatpush3.bf16.msra.mxu0 %v3677_v27 }
0x113c   :  { %3106 = vmatprep.subr.bf16.mxu0 %v3407_v0 }
0x11e9   :  { %v3034_v61 = vpop.f32.mrb[48].mxu1 }
0x11ea   :  { %v1798_v1 = vpop.f32.mrb[49].mxu1 }
0x11eb   :  { %v3035_v10 = vpop.f32.mrb[50].mxu1 }
0x11ec   :  { %v1862_v11 = vpack.c.bf16 %v3035_v10, %v3034_v61  ;;  %v1801_v12 = vpop.f32.mrb[51].mxu1 }
0x11ed   :  { %v1861_v13 = vpack.c.bf16 %v1801_v12, %v1798_v1 }
0x11ee   :  { %v1870_v26 = vmul.bf16 %v3601_v23, %v1862_v11 }
0x11ef   :  { %v1869_v8 = vmul.bf16 %v3598_v18, %v1861_v13 }
0x11f0   :  { %v1999_v44 = vsel %vm76_vm1, %v1870_v26, 0 }
0x11f1   :  { %v1996_v14 = vsel %vm76_vm1, %v1869_v8, 0  ;;  %v3038_v9 = vpop.f32.mrb[52].mxu1  ;;  %v3052_v37 = vpop.f32.mrb[48].mxu0 }
0x11f2   :  { %3067 = vmatpush3.bf16.xpose.msra.mxu1 %v1996_v14  ;;  %v1814_v15 = vpop.f32.mrb[53].mxu1  ;;  %v1912_v43 = vpop.f32.mrb[49].mxu0 }
0x11f3   :  { %3068 = vmatprep.subr.bf16.mxu1 %v3407_v0  ;;  %v3039_v22 = vpop.f32.mrb[54].mxu1  ;;  %v3053_v38 = vpop.f32.mrb[50].mxu0 }
0x11f4   :  { %v1864_v24 = vpack.c.bf16 %v3039_v22, %v3038_v9  ;;  %v1817_v25 = vpop.f32.mrb[55].mxu1  ;;  %v1976_v61 = vpack.c.bf16 %v3053_v38, %v3052_v37  ;;  %v1915_v55 = vpop.f32.mrb[51].mxu0 }
0x11f5   :  { %v1863_v27 = vpack.c.bf16 %v1817_v25, %v1814_v15  ;;  %v1975_v17 = vpack.c.bf16 %v1915_v55, %v1912_v43 }
0x11f6   :  { %v1872_v62 = vmul.bf16 %v3611_v45, %v1864_v24 }
0x11f7   :  { %v1871_v40 = vmul.bf16 %v3606_v32, %v1863_v27 }
0x11f8   :  { %v2005_v7 = vsel %vm76_vm1, %v1872_v62, 0 }
0x11f9   :  { %v3042_v39 = vpop.f32.mrb[56].mxu1  ;;  %v2002_v49 = vsel %vm76_vm1, %v1871_v40, 0 }
0x11fa   :  { %3069 = vmatpush3.bf16.xpose.msra.mxu1 %v1999_v44  ;;  %v1830_v41 = vpop.f32.mrb[57].mxu1 }
0x11fb   :  { %3070 = vmatprep.subr.bf16.mxu1 %v3407_v0  ;;  %v3043_v18 = vpop.f32.mrb[58].mxu1 }
0x11fc   :  { %v1866_v46 = vpack.c.bf16 %v3043_v18, %v3042_v39  ;;  %v1833_v3 = vpop.f32.mrb[59].mxu1 }
0x11fd   :  { %v1865_v42 = vpack.c.bf16 %v1833_v3, %v1830_v41 }
0x11fe   :  { %v1874_v29 = vmul.bf16 %v3621_v56, %v1866_v46 }
0x11ff   :  { %v1873_v19 = vmul.bf16 %v3616_v51, %v1865_v42 }
0x1200   :  { %v2011_v16 = vsel %vm76_vm1, %v1874_v29, 0 }
0x1201   :  { %v3046_v50 = vpop.f32.mrb[60].mxu1  ;;  %v2008_v28 = vsel %vm76_vm1, %v1873_v19, 0 }
0x1202   :  { %3071 = vmatpush3.bf16.xpose.msra.mxu1 %v2002_v49  ;;  %v1846_v52 = vpop.f32.mrb[61].mxu1 }
0x1203   :  { %3072 = vmatprep.subr.bf16.mxu1 %v3407_v0  ;;  %v3047_v54 = vpop.f32.mrb[62].mxu1 }
0x1204   :  { %v1868_v57 = vpack.c.bf16 %v3047_v54, %v3046_v50  ;;  %v1849_v58 = vpop.f32.mrb[63].mxu1  ;;  %v3305_v50 = vld [vmem:[#allocation5 + $0x170] sm:$0xff]  }
0x1205   :  { %v1867_v63 = vpack.c.bf16 %v1849_v58, %v1846_v52  ;;  %v1983_v52 = vmul.bf16 %v3305_v50, %v1975_v17 }
0x1206   :  { %v1876_v5 = vmul.bf16 %v3631_v2, %v1868_v57  ;;  %v1984_v57 = vmul.bf16 %v3601_v23, %v1976_v61 }
0x1207   :  { %v1875_v20 = vmul.bf16 %v3626_v60, %v1867_v63 }
0x1208   :  { %v2017_v31 = vsel %vm76_vm1, %v1876_v5, 0 }
0x1209   :  { %v2014_v30 = vsel %vm76_vm1, %v1875_v20, 0 }
0x120a   :  { %3073 = vmatpush3.bf16.xpose.msra.mxu1 %v2005_v7 }
0x120b   :  { %3074 = vmatprep.subr.bf16.mxu1 %v3407_v0 }
0x1212   :  { %3075 = vmatpush3.bf16.xpose.msra.mxu1 %v2008_v28 }
0x1213   :  { %3076 = vmatprep.subr.bf16.mxu1 %v3407_v0 }
0x121a   :  { %3077 = vmatpush3.bf16.xpose.msra.mxu1 %v2011_v16 }
0x121b   :  { %3078 = vmatprep.subr.bf16.mxu1 %v3407_v0 }
0x1222   :  { %3079 = vmatpush3.bf16.xpose.msra.mxu1 %v2014_v30 }
0x1223   :  { %3080 = vmatprep.subr.bf16.mxu1 %v3407_v0 }
0x122a   :  { %3081 = vmatpush3.bf16.xpose.msra.mxu1 %v2017_v31  ;;  %v3234_v31 = vld [vmem:[#allocation5 + $0x118] sm:$0xff]  }
0x122b   :  { %3126 = vmatprep.subr.bf16.mxu1 %v3407_v0 }
0x1231   :  { %3083 = vmatmul.mubr.msk.bf16.vlgmr.msra.gmra.mrb[64].mxu1 %vm76_vm1, %v1991_v21  ;;  %v3056_v21 = vpop.f32.mrb[52].mxu0 }
0x1232   :  { %3130 = vmatprep.mubr.msk.bf16.mxu1 %vm3408_vm0, %v3407_v0  ;;  %v1928_v1 = vpop.f32.mrb[53].mxu0 }
0x1233   :  { %v3057_v10 = vpop.f32.mrb[54].mxu0 }
0x1234   :  { %v1978_v11 = vpack.c.bf16 %v3057_v10, %v3056_v21  ;;  %v1931_v12 = vpop.f32.mrb[55].mxu0 }
0x1235   :  { %v1977_v13 = vpack.c.bf16 %v1931_v12, %v1928_v1 }
0x1236   :  { %v1986_v62 = vmul.bf16 %v3611_v45, %v1978_v11 }
0x1237   :  { %v1985_v58 = vmul.bf16 %v3606_v32, %v1977_v13 }
0x1304   :  { %v2053_v4 = vpop.f32.mrb[64].mxu1 }
0x1305   :  { %v2054_v6 = vadd.f32 %v2053_v4, %v3656_v53  ;;  %v3084_v33 = vpop.f32.mrb[65].mxu1  ;;  %v3060_v53 = vpop.f32.mrb[56].mxu0 }
0x1306   :  { %v2056_v34 = vpop.f32.mrb[66].mxu1  ;;  %v1944_v8 = vpop.f32.mrb[57].mxu0 }
0x1307   :  { %v2057_v35 = vadd.f32 %v2056_v34, %v3658_v59  ;;  %2060 = vmax.xlane.f32.xlu0 %v2054_v6  ;;  %v3085_v36 = vpop.f32.mrb[67].mxu1  ;;  %v3061_v14 = vpop.f32.mrb[58].mxu0 }
0x1308   :  { %v1980_v9 = vpack.c.bf16 %v3061_v14, %v3060_v53  ;;  %v1947_v59 = vpop.f32.mrb[59].mxu0  ;;  %v2644_v36 = vld [vmem:[#allocation7 + $0x10] ss:$0 sm:$0xff] }
0x1309   :  { %2062 = vmax.xlane.f32.xlu1 %v2057_v35  ;;  %v1979_v15 = vpack.c.bf16 %v1947_v59, %v1944_v8  ;;  %v3064_v22 = vpop.f32.mrb[60].mxu0 }
0x130a   :  { %v1960_v24 = vpop.f32.mrb[61].mxu0  ;;  %v1988_v23 = vmul.bf16 %v3621_v56, %v1980_v9 }
0x130b   :  { %v3065_v25 = vpop.f32.mrb[62].mxu0  ;;  %v1987_v63 = vmul.bf16 %v3616_v51, %v1979_v15  ;;  %v3233_v51 = vld [vmem:[#allocation5 + $0x110] sm:$0xff]  }
0x130c   :  { %v1982_v26 = vpack.c.bf16 %v3065_v25, %v3064_v22  ;;  %v1963_v27 = vpop.f32.mrb[63].mxu0  ;;  %3127 = vmatpush3.bf16.msra.mxu1 %v3233_v51  ;;  %v3237_v25 = vld [vmem:[#allocation5 + $0x130] sm:$0xff]   ;;  %v3242_v51 = vld [vmem:[#allocation5 + $0x158] sm:$0xff]  }
0x130d   :  { %v1981_v44 = vpack.c.bf16 %v1963_v27, %v1960_v24  ;;  %3128 = vmatprep.subr.bf16.mxu1 %v3407_v0  ;;  %v3235_v24 = vld [vmem:[#allocation5 + $0x120] sm:$0xff]  }
0x130e   :  { %v1990_v45 = vmul.bf16 %v3631_v2, %v1982_v26  ;;  %v3238_v26 = vld [vmem:[#allocation5 + $0x138] sm:$0xff]  }
0x130f   :  { %v1989_v32 = vmul.bf16 %v3626_v60, %v1981_v44 }
0x1310   :  { %3129 = vmatpush3.bf16.msra.mxu1 %v3234_v31 }
0x1311   :  { %3142 = vmatprep.subr.bf16.mxu1 %v3407_v0 }
0x1394   :  { %v2061_v39 = vpop.xlane.xlu0 %2060 }
0x1395   :  { %v2064_v41 = vsub.f32 %v2054_v6, %v2061_v39 }
0x1396   :  { %v2063_v18 = vpop.xlane.xlu1 %2062 }
0x1397   :  { %v2066_v46 = vmul.f32 1.442695, %v2064_v41  ;;  %v2065_v3 = vsub.f32 %v2057_v35, %v2063_v18 }
0x1399   :  { %v2068_v40 = vmul.f32 1.442695, %v2065_v3  ;;  %3285 = vpow2.f32 %v2066_v46 }
0x139b   :  { %3287 = vpow2.f32 %v2068_v40  ;;  %v2645_v40 = vld [vmem:[#allocation7 + $0x13] ss:$0 sm:$0xff] }
0x13a3   :  { %v3286_v42 = vpop.eup %3285 }
0x13a5   :  { %v3288_v49 = vpop.eup %3287 }
0x13a6   :  { %v2070_v54 = vpack.c.bf16 %v3288_v49, %v3286_v42 }
0x13a8   :  { %3103 = vmatmul.mubr.bf16.vlgmr.msra.gmra.mrb[64].mxu0 %v2070_v54  ;;  %v2646_v54 = vld [vmem:[#allocation7 + $0x14] ss:$0 sm:$0xff] }
0x13a9   :  { %3107 = vmatpush3.bf16.msra.mxu0 %v1983_v52  ;;  %3122 = vmatprep.mubr.msk.bf16.mxu0 %vm3408_vm0, %v3407_v0 }
0x13aa   :  { %3108 = vmatprep.subr.bf16.mxu0 %v3407_v0 }
0x13ad   :  { %3109 = vmatpush3.bf16.msra.mxu0 %v1984_v57 }
0x13ae   :  { %3110 = vmatprep.subr.bf16.mxu0 %v3407_v0 }
0x13b1   :  { %3111 = vmatpush3.bf16.msra.mxu0 %v1985_v58 }
0x13b2   :  { %3112 = vmatprep.subr.bf16.mxu0 %v3407_v0 }
0x13b5   :  { %3113 = vmatpush3.bf16.msra.mxu0 %v1986_v62 }
0x13b6   :  { %3114 = vmatprep.subr.bf16.mxu0 %v3407_v0 }
0x13b9   :  { %3115 = vmatpush3.bf16.msra.mxu0 %v1987_v63 }
0x13ba   :  { %3116 = vmatprep.subr.bf16.mxu0 %v3407_v0 }
0x13bd   :  { %3117 = vmatpush3.bf16.msra.mxu0 %v1988_v23  ;;  %v3239_v23 = vld [vmem:[#allocation5 + $0x140] sm:$0xff]  }
0x13be   :  { %3118 = vmatprep.subr.bf16.mxu0 %v3407_v0 }
0x13c1   :  { %3119 = vmatpush3.bf16.msra.mxu0 %v1989_v32  ;;  %v3240_v32 = vld [vmem:[#allocation5 + $0x148] sm:$0xff]  }
0x13c2   :  { %3120 = vmatprep.subr.bf16.mxu0 %v3407_v0 }
0x13c5   :  { %3121 = vmatpush3.bf16.msra.mxu0 %v1990_v45  ;;  %v3241_v45 = vld [vmem:[#allocation5 + $0x150] sm:$0xff]  }
0x13c6   :  { %3134 = vmatprep.subr.bf16.mxu0 %v3407_v0 }
0x147b   :  { %v2105_v56 = vpop.f32.mrb[64].mxu0 }
0x147c   :  { %v2112_v7 = vmax.f32 %v2105_v56, 1e-30  ;;  %v3104_v19 = vpop.f32.mrb[65].mxu0  ;;  %v3243_v56 = vld [vmem:[#allocation5 + $0x160] sm:$0xff]  }
0x147d   :  { %v2108_v28 = vpop.f32.mrb[66].mxu0  ;;  %v2647_v19 = vld [vmem:[#allocation7 + $0x11] ss:$0 sm:$0xff] }
0x147e   :  { %3289 = vrcp.f32 %v2112_v7  ;;  %v2113_v60 = vmax.f32 %v2108_v28, 1e-30  ;;  %v3105_v29 = vpop.f32.mrb[67].mxu0  ;;  %v3244_v7 = vld [vmem:[#allocation5 + $0x168] sm:$0xff]  }
0x1480   :  { %3291 = vrcp.f32 %v2113_v60 }
0x1488   :  { %v3290_v16 = vpop.eup %3289 }
0x1489   :  { %v2115_v20 = vmul.f32 %v3290_v16, %v3286_v42 }
0x148a   :  { %v3292_v2 = vpop.eup %3291 }
0x148b   :  { %v2117_v30 = vmul.f32 %v3292_v2, %v3288_v49 }
0x148d   :  { %v2118_v5 = vpack.c.bf16 %v2117_v30, %v2115_v20 }
0x148f   :  { %3123 = vmatmul.mubr.bf16.vlgmr.msra.gmra.mrb[68].mxu0 %v2118_v5 }
0x1490   :  { %3138 = vmatprep.mubr.msk.bf16.mxu0 %vm3408_vm0, %v3407_v0  ;;  %3135 = vmatpush3.bf16.msra.mxu0 %v3235_v24 }
0x1491   :  { %3136 = vmatprep.subr.bf16.mxu0 %v3407_v0 }
0x1562   :  { %v2153_v4 = vpop.f32.mrb[68].mxu0 }
0x1563   :  { %v3124_v6 = vpop.f32.mrb[69].mxu0 }
0x1564   :  { %v2156_v33 = vpop.f32.mrb[70].mxu0 }
0x1565   :  { %v2164_v34 = vpack.c.bf16 %v2156_v33, %v2153_v4  ;;  %v3125_v35 = vpop.f32.mrb[71].mxu0 }
0x1567   :  { %3131 = vmatmul.mubr.msk.bf16.vlgmr.msra.gmra.mrb[68].mxu1 %vm76_vm1, %v2164_v34 }
0x1568   :  { %3158 = vmatprep.mubr.msk.bf16.mxu1 %vm3408_vm0, %v3407_v0  ;;  %3143 = vmatpush3.bf16.msra.mxu1 %v3237_v25 }
0x1569   :  { %3144 = vmatprep.subr.bf16.mxu1 %v3407_v0 }
0x156c   :  { %3145 = vmatpush3.bf16.msra.mxu1 %v3238_v26 }
0x156d   :  { %3146 = vmatprep.subr.bf16.mxu1 %v3407_v0 }
0x1570   :  { %3147 = vmatpush3.bf16.msra.mxu1 %v3239_v23 }
0x1571   :  { %3148 = vmatprep.subr.bf16.mxu1 %v3407_v0 }
0x1574   :  { %3149 = vmatpush3.bf16.msra.mxu1 %v3240_v32 }
0x1575   :  { %3150 = vmatprep.subr.bf16.mxu1 %v3407_v0 }
0x1578   :  { %3151 = vmatpush3.bf16.msra.mxu1 %v3241_v45 }
0x1579   :  { %3152 = vmatprep.subr.bf16.mxu1 %v3407_v0 }
0x157c   :  { %3153 = vmatpush3.bf16.msra.mxu1 %v3242_v51 }
0x157d   :  { %3154 = vmatprep.subr.bf16.mxu1 %v3407_v0 }
0x1580   :  { %3155 = vmatpush3.bf16.msra.mxu1 %v3243_v56 }
0x1581   :  { %3156 = vmatprep.subr.bf16.mxu1 %v3407_v0 }
0x1584   :  { %3157 = vmatpush3.bf16.msra.mxu1 %v3244_v7 }
0x163a   :  { %v2214_v37 = vpop.f32.mrb[68].mxu1 }
0x163b   :  { %v2226_v43 = vadd.f32 %v2644_v36, %v2214_v37  ;;  %v3132_v38 = vpop.f32.mrb[69].mxu1 }
0x163c   :  { %v2217_v61 = vpop.f32.mrb[70].mxu1 }
0x163d   :  { %v2227_v55 = vadd.f32 %v2644_v36, %v2217_v61  ;;  %v3133_v17 = vpop.f32.mrb[71].mxu1  ;;  %v2228_v21 = vadd.f32 %v2226_v43, %v3733_v47  ;;  %v2659_v43 = vld [vmem:[#allocation7 + $0x12] ss:$0 sm:$0xff] }
0x163f   :  { %v2232_v1 = vsel %vm76_vm1, %v2228_v21, 0.0  ;;  %v2229_v10 = vadd.f32 %v2227_v55, %v3735_v48  ;;  %v3236_v48 = vld [vmem:[#allocation5 + $0x128] sm:$0xff]  }
0x1640   :  { %2233 = vadd.xlane.f32.xlu0 %v2232_v1  ;;  %3137 = vmatpush3.bf16.msra.mxu0 %v3236_v48 }
0x1641   :  { %v2235_v11 = vsel %vm76_vm1, %v2229_v10, 0.0 }
0x1642   :  { %2236 = vadd.xlane.f32.xlu1 %v2235_v11 }
0x16cd   :  { %v2234_v12 = vpop.xlane.xlu0 %2233 }
0x16ce   :  { %v2238_v13 = vmul.f32 0.03125, %v2234_v12 }
0x16cf   :  { %v2237_v53 = vpop.xlane.xlu1 %2236 }
0x16d0   :  { %v2240_v8 = vsub.f32 %v2228_v21, %v2238_v13  ;;  %v2239_v14 = vmul.f32 0.03125, %v2237_v53 }
0x16d2   :  { %v2241_v9 = vsub.f32 %v2229_v10, %v2239_v14  ;;  %v2242_v59 = vmul.f32 %v2240_v8, %v2240_v8 }
0x16d4   :  { %v2244_v15 = vsel %vm76_vm1, %v2242_v59, 0.0  ;;  %v2243_v22 = vmul.f32 %v2241_v9, %v2241_v9 }
0x16d5   :  { %2245 = vadd.xlane.f32.xlu0 %v2244_v15 }
0x16d6   :  { %v2247_v47 = vsel %vm76_vm1, %v2243_v22, 0.0 }
0x16d7   :  { %2248 = vadd.xlane.f32.xlu1 %v2247_v47 }
0x1762   :  { %v2246_v27 = vpop.xlane.xlu0 %2245 }
0x1763   :  { %v2250_v44 = vmul.f32 0.03125, %v2246_v27 }
0x1764   :  { %v2249_v39 = vpop.xlane.xlu1 %2248 }
0x1765   :  { %v2252_v41 = vadd.f32 1e-05, %v2250_v44  ;;  %v2251_v18 = vmul.f32 0.03125, %v2249_v39 }
0x1767   :  { %3293 = vrsqrt.f32 %v2252_v41  ;;  %v2253_v46 = vadd.f32 1e-05, %v2251_v18 }
0x1769   :  { %3295 = vrsqrt.f32 %v2253_v46  ;;  %v2660_v46 = vld [vmem:[#allocation7 + $0x15] ss:$0 sm:$0xff] }
0x1771   :  { %v3294_v3 = vpop.eup %3293 }
0x1772   :  { %v2256_v42 = vmul.f32 %v3294_v3, %v2240_v8 }
0x1773   :  { %v3296_v49 = vpop.eup %3295 }
0x1774   :  { %v2262_v50 = vmul.f32 %v2645_v40, %v2256_v42  ;;  %v2257_v52 = vmul.f32 %v3296_v49, %v2241_v9  ;;  %v2661_v42 = vld [vmem:[#allocation7 + $0x16] ss:$0 sm:$0xff] }
0x1776   :  { %v2263_v57 = vmul.f32 %v2645_v40, %v2257_v52  ;;  %v2268_v58 = vadd.f32 %v2646_v54, %v2262_v50 }
0x1778   :  { %v2269_v62 = vadd.f32 %v2646_v54, %v2263_v57 }
0x177a   :  { %v2274_v63 = vpack.c.bf16 %v2269_v62, %v2268_v58 }
0x177c   :  { %3139 = vmatmul.mubr.msk.bf16.vlgmr.msra.gmra.mrb[72].mxu0 %vm76_vm1, %v2274_v63 }
0x184f   :  { %v2329_v28 = vpop.f32.mrb[72].mxu0 }
0x1850   :  { %v2330_v60 = vadd.f32 %v2647_v19, %v2329_v28  ;;  %v3140_v29 = vpop.f32.mrb[73].mxu0 }
0x1851   :  { %v2332_v16 = vpop.f32.mrb[74].mxu0 }
0x1852   :  { %v2338_v2 = vmul.f32 0.70710677, %v2330_v60  ;;  %v2333_v20 = vadd.f32 %v2647_v19, %v2332_v16  ;;  %v3141_v30 = vpop.f32.mrb[75].mxu0  ;;  %v2336_v33 = vmul.f32 0.5, %v2330_v60 }
0x1854   :  { %3297 = verf.f32 %v2338_v2  ;;  %v2339_v5 = vmul.f32 0.70710677, %v2333_v20  ;;  %v2337_v34 = vmul.f32 0.5, %v2333_v20 }
0x1856   :  { %3299 = verf.f32 %v2339_v5 }
0x185e   :  { %v3298_v31 = vpop.eup %3297 }
0x185f   :  { %v2342_v4 = vadd.f32 1.0, %v3298_v31 }
0x1860   :  { %v3300_v6 = vpop.eup %3299 }
0x1861   :  { %v2343_v35 = vadd.f32 1.0, %v3300_v6  ;;  %v2344_v0 = vmul.f32 %v2342_v4, %v2336_v33 }
0x1863   :  { %v2345_v36 = vmul.f32 %v2343_v35, %v2337_v34 }
0x1865   :  { %v2362_v37 = vpack.c.bf16 %v2345_v36, %v2344_v0 }
0x1867   :  { %3159 = vmatmul.mubr.bf16.vlgmr.msra.gmra.mrb[72].mxu1 %v2362_v37 }
0x193a   :  { %v2445_v38 = vpop.f32.mrb[72].mxu1 }
0x193b   :  { %v2457_v61 = vadd.f32 %v2659_v43, %v2445_v38  ;;  %v3160_v55 = vpop.f32.mrb[73].mxu1 }
0x193c   :  { %v2448_v17 = vpop.f32.mrb[74].mxu1 }
0x193d   :  { %v2458_v21 = vadd.f32 %v2659_v43, %v2448_v17  ;;  %v3161_v1 = vpop.f32.mrb[75].mxu1  ;;  %v2459_v10 = vadd.f32 %v2457_v61, %v2268_v58 }
0x193f   :  { %v2463_v11 = vsel %vm76_vm1, %v2459_v10, 0.0  ;;  %v2460_v12 = vadd.f32 %v2458_v21, %v2269_v62 }
0x1940   :  { %2464 = vadd.xlane.f32.xlu0 %v2463_v11 }
0x1941   :  { %v2466_v13 = vsel %vm76_vm1, %v2460_v12, 0.0 }
0x1942   :  { %2467 = vadd.xlane.f32.xlu1 %v2466_v13 }
0x19cd   :  { %v2465_v53 = vpop.xlane.xlu0 %2464 }
0x19ce   :  { %v2469_v8 = vmul.f32 0.03125, %v2465_v53 }
0x19cf   :  { %v2468_v14 = vpop.xlane.xlu1 %2467 }
0x19d0   :  { %v2471_v9 = vsub.f32 %v2459_v10, %v2469_v8  ;;  %v2470_v59 = vmul.f32 0.03125, %v2468_v14 }
0x19d2   :  { %v2472_v15 = vsub.f32 %v2460_v12, %v2470_v59  ;;  %v2473_v22 = vmul.f32 %v2471_v9, %v2471_v9 }
0x19d4   :  { %v2475_v47 = vsel %vm76_vm1, %v2473_v22, 0.0  ;;  %v2474_v24 = vmul.f32 %v2472_v15, %v2472_v15 }
0x19d5   :  { %2476 = vadd.xlane.f32.xlu0 %v2475_v47 }
0x19d6   :  { %v2478_v48 = vsel %vm76_vm1, %v2474_v24, 0.0 }
0x19d7   :  { %2479 = vadd.xlane.f32.xlu1 %v2478_v48 }
0x1a62   :  { %v2477_v25 = vpop.xlane.xlu0 %2476 }
0x1a63   :  { %v2481_v26 = vmul.f32 0.03125, %v2477_v25 }
0x1a64   :  { %v2480_v27 = vpop.xlane.xlu1 %2479 }
0x1a65   :  { %v2483_v44 = vadd.f32 1e-05, %v2481_v26  ;;  %v2482_v39 = vmul.f32 0.03125, %v2480_v27 }
0x1a67   :  { %3301 = vrsqrt.f32 %v2483_v44  ;;  %v2484_v41 = vadd.f32 1e-05, %v2482_v39 }
0x1a69   :  { %3303 = vrsqrt.f32 %v2484_v41 }
0x1a71   :  { %v3302_v18 = vpop.eup %3301 }
0x1a72   :  { %v2487_v3 = vmul.f32 %v3302_v18, %v2471_v9 }
0x1a73   :  { %v3304_v40 = vpop.eup %3303 }
0x1a74   :  { %v2488_v49 = vmul.f32 %v3304_v40, %v2472_v15  ;;  %v2493_v50 = vmul.f32 %v2660_v46, %v2487_v3 }
0x1a76   :  { %v2494_v52 = vmul.f32 %v2660_v46, %v2488_v49  ;;  %v2499_v54 = vadd.f32 %v2661_v42, %v2493_v50 }
0x1a78   :  { %v2500_v57 = vadd.f32 %v2661_v42, %v2494_v52  ;;  %2501 = vst.msk [vmem:[#allocation8] sm:$0xff] %vm76_vm1, %v2499_v54 }
0x1a7a   :  { %2502 = vst.msk [vmem:[#allocation8 + $0x8] sm:$0xff] %vm76_vm1, %v2500_v57 }
0x1a7b   :  { %3383 = shalt.err (!%p3380_p0)
}
0x1a7c   :  { %s3384_s27 = scalar_lea.hbm %s3902_s3, 256 }
0x1a7d   :  { %p3385_p1 = scmp.ne.s32.totalorder %s3902_s3, %s3384_s27  ;;  %p3388_p2 = scmp.lt.u32.totalorder %s3384_s27, %s3902_s3 }
0x1a7f   :  { %p3390_p3 = pnand %p3388_p2, %p3385_p1 }
0x1a81   :  { %3393 = shalt.err (!%p3390_p3)
}
0x1a82   :  { %2514 = dma.vmem_to_hbm [thread:$0]  %s2509_s23, 256, %s3902_s3, [#allocation4], %s3404_s1, %s3404_s1, %s3405_s9  }
0x1a83   :  { %3398 = dma.done.wait [#allocation4], 256  }
0x1a84   :  { %3399 = vsyncadd [#allocation4], 4294967040 }
0x1a85   :  { %2518 = vsyncpa [#allocation3], 1 }
0x1a86   :  { %2519 = vsyncpa [#allocation6], 1 }
0x1a87   :  { %2520 = vsyncpa [#allocation4], 1 }

</bundles_post_ra>
